<compile_context>
chip_gen: v7x
topology: tpu7x:2x2x1
jax: 0.10.0
libtpu: 0.0.40
codegen_flags: <defaults>
</compile_context>

<pallas_src>
import functools

import numpy as np

import jax
import jax.numpy as jnp
from jax.experimental import pallas as pl
from jax.experimental.pallas import tpu as pltpu


# ---------------------------------------------------------------------------
# small helpers
# ---------------------------------------------------------------------------
def _round_up(x, m):
    return ((x + m - 1) // m) * m


def _pad2d(x, rows, cols):
    return jnp.pad(x, ((0, rows - x.shape[0]), (0, cols - x.shape[1])))


_VMEM_LIMIT = 32 * 1024 * 1024        # safe scoped-VMEM request on v5e/v6e/v7x
# Per-copy cap for keeping the streamed operand (X / XW2) fully VMEM-resident.
# Pallas may hold 2 copies of a constant-index block, so 2x this must still
# leave room for A double-buffers / accumulator / output on v7x (32 MiB).
_H_RESIDENT_BYTES = 6 * 1024 * 1024


# ---------------------------------------------------------------------------
# Pallas kernels
# ---------------------------------------------------------------------------
def _first_last(s, brow_ref):
    """Is this grid step the first / last block of its output row-tile?"""
    row = brow_ref[s]
    is_first = jnp.logical_or(s == 0, row != brow_ref[jnp.maximum(s - 1, 0)])
    is_last = row != brow_ref[s + 1]          # sentinel (-1) at index S
    return is_first, is_last


def _h_tile(h_ref, bcol_ref, s, tile, resident):
    """Column-tile of the streamed operand (resident => dynamic VMEM slice)."""
    if resident:
        start = pl.multiple_of(bcol_ref[s] * tile, tile)
        return h_ref[pl.ds(start, tile), :]
    return h_ref[...]


def _conv1_kernel(brow_ref, bcol_ref, a_ref, x_ref, drow_ref,
                  w1_ref, b1_ref, w2_ref, o_ref, acc_ref, *, tile, resident):
    # out = dinv * ( relu( dinv * ((A+I) @ ((dinv*X) @ W1)) + b1 ) @ W2 )
    #     = dinv * ( relu( A_hat @ (X @ W1) + b1 ) @ W2 )   [pre-scaled for conv2]
    s = pl.program_id(0)
    is_first, is_last = _first_last(s, brow_ref)

    @pl.when(is_first)
    def _():
        acc_ref[...] = jnp.zeros_like(acc_ref)

    # inline layer-1 feature transform (K = c_in is tiny; recompute per block)
    x_t = _h_tile(x_ref, bcol_ref, s, tile, resident)                # f32, pre-scaled
    h = jnp.dot(x_t, w1_ref[...], preferred_element_type=jnp.float32)
    a = a_ref[...].astype(jnp.float32).astype(jnp.bfloat16)          # exact 0/1 counts
    acc_ref[...] += jnp.dot(a, h.astype(jnp.bfloat16),
                            preferred_element_type=jnp.float32)

    @pl.when(is_last)
    def _():
        drow = drow_ref[...]                                         # (tile, 1) f32
        t = jnp.maximum(drow * acc_ref[...] + b1_ref[...], 0.0)      # relu(conv1)
        xw2 = jnp.dot(t.astype(jnp.bfloat16), w2_ref[...],
                      preferred_element_type=jnp.float32)            # fused layer-2 XW
        o_ref[...] = (drow * xw2).astype(o_ref.dtype)                # dinv pre-scale


def _conv2_kernel(brow_ref, bcol_ref, a_ref, h_ref, drow_ref, b2_ref,
                  o_ref, acc_ref, *, tile, resident):
    # out = relu( dinv * ((A+I) @ H_scaled) + b2 ) = relu( A_hat @ XW2 + b2 )
    s = pl.program_id(0)
    is_first, is_last = _first_last(s, brow_ref)

    @pl.when(is_first)
    def _():
        acc_ref[...] = jnp.zeros_like(acc_ref)

    h_t = _h_tile(h_ref, bcol_ref, s, tile, resident)                # bf16
    a = a_ref[...].astype(jnp.float32).astype(jnp.bfloat16)
    acc_ref[...] += jnp.dot(a, h_t, preferred_element_type=jnp.float32)

    @pl.when(is_last)
    def _():
        drow = drow_ref[...]
        out = jnp.maximum(drow * acc_ref[...] + b2_ref[...], 0.0)
        # zero the padded rows (drow == 0) so downstream never sees relu(b2)
        o_ref[...] = jnp.where(drow > 0.0, out, 0.0).astype(o_ref.dtype)


def _pool_mlp_kernel(p_ref, x_ref, inv_ref, w1_ref, b1_ref, w2_ref, b2_ref,
                     w3_ref, b3_ref, w4_ref, b4_ref, o_ref, acc_ref):
    # acc = P @ X  (bf16 x bf16, f32 acc), mean + 4-layer MLP head in epilogue.
    k = pl.program_id(0)

    @pl.when(k == 0)
    def _():
        acc_ref[...] = jnp.zeros_like(acc_ref)

    acc_ref[...] += jnp.dot(p_ref[...], x_ref[...],
                            preferred_element_type=jnp.float32)

    @pl.when(k == pl.num_programs(0) - 1)
    def _():
        h = acc_ref[...] * inv_ref[...]                              # mean pool (f32)
        h = jnp.dot(h, w1_ref[...], preferred_element_type=jnp.float32) + b1_ref[...]
        h = jnp.where(h >= 0.0, h, 0.2 * h)                          # leaky_relu(0.2)
        # TODO(synk): F.dropout(p=0.1) training-mode not applied (inference).
        h = jnp.dot(h, w2_ref[...], preferred_element_type=jnp.float32) + b2_ref[...]
        h = jnp.where(h >= 0.0, h, 0.1 * h)                          # leaky_relu(0.1)
        h = jnp.dot(h, w3_ref[...], preferred_element_type=jnp.float32) + b3_ref[...]
        h = jnp.where(h >= 0.0, h, 0.1 * h)                          # leaky_relu(0.1)
        h = jnp.dot(h, w4_ref[...], preferred_element_type=jnp.float32) + b4_ref[...]
        o_ref[...] = jnp.maximum(h, 0.0)                             # final ReLU


# ---------------------------------------------------------------------------
# pallas_call wrappers
# ---------------------------------------------------------------------------
def _conv1(a_blocks, brow_ext, bcol, x_scaled, dinv, w1, b1, w2,
           *, tile, n_pad, resident):
    n_blocks = bcol.shape[0]
    c_in = x_scaled.shape[1]
    f1 = w1.shape[1]
    f2 = w2.shape[1]

    if resident:
        x_spec = pl.BlockSpec((n_pad, c_in), lambda s, br, bc: (0, 0))
    else:
        x_spec = pl.BlockSpec((tile, c_in), lambda s, br, bc: (bc[s], 0))

    kernel = functools.partial(_conv1_kernel, tile=tile, resident=resident)
    return pl.pallas_call(
        kernel,
        out_shape=jax.ShapeDtypeStruct((n_pad, f2), jnp.bfloat16),
        grid_spec=pltpu.PrefetchScalarGridSpec(
            num_scalar_prefetch=2, grid=(n_blocks,),
            in_specs=[
                pl.BlockSpec((tile, tile), lambda s, br, bc: (s, 0)),      # A block
                x_spec,                                                     # dinv*X
                pl.BlockSpec((tile, 1), lambda s, br, bc: (br[s], 0)),     # dinv rows
                pl.BlockSpec((c_in, f1), lambda s, br, bc: (0, 0)),        # W1
                pl.BlockSpec((1, f1), lambda s, br, bc: (0, 0)),           # b1
                pl.BlockSpec((f1, f2), lambda s, br, bc: (0, 0)),          # W2
            ],
            out_specs=pl.BlockSpec((tile, f2), lambda s, br, bc: (br[s], 0)),
            scratch_shapes=[pltpu.VMEM((tile, f1), jnp.float32)]),
        compiler_params=pltpu.CompilerParams(
            dimension_semantics=("arbitrary",),
            vmem_limit_bytes=_VMEM_LIMIT),
    )(brow_ext, bcol, a_blocks, x_scaled, dinv, w1, b1, w2)


def _conv2(a_blocks, brow_ext, bcol, h, dinv, b2, *, tile, n_pad, resident):
    n_blocks = bcol.shape[0]
    f = h.shape[1]

    if resident:
        h_spec = pl.BlockSpec((n_pad, f), lambda s, br, bc: (0, 0))
    else:
        h_spec = pl.BlockSpec((tile, f), lambda s, br, bc: (bc[s], 0))

    kernel = functools.partial(_conv2_kernel, tile=tile, resident=resident)
    return pl.pallas_call(
        kernel,
        out_shape=jax.ShapeDtypeStruct((n_pad, f), jnp.bfloat16),
        grid_spec=pltpu.PrefetchScalarGridSpec(
            num_scalar_prefetch=2, grid=(n_blocks,),
            in_specs=[
                pl.BlockSpec((tile, tile), lambda s, br, bc: (s, 0)),      # A block
                h_spec,                                                     # dinv*XW2
                pl.BlockSpec((tile, 1), lambda s, br, bc: (br[s], 0)),     # dinv rows
                pl.BlockSpec((1, f), lambda s, br, bc: (0, 0)),            # b2
            ],
            out_specs=pl.BlockSpec((tile, f), lambda s, br, bc: (br[s], 0)),
            scratch_shapes=[pltpu.VMEM((tile, f), jnp.float32)]),
        compiler_params=pltpu.CompilerParams(
            dimension_semantics=("arbitrary",),
            vmem_limit_bytes=_VMEM_LIMIT),
    )(brow_ext, bcol, a_blocks, h, dinv, b2)


def _pool_mlp(pool_mat, x, inv_counts, mlp_w, mlp_b, *, tile):
    g_pad, n_pad = pool_mat.shape
    f = x.shape[1]
    w1, w2, w3, w4 = mlp_w
    b1, b2, b3, b4 = mlp_b

    def _const(shape):
        return pl.BlockSpec(shape, lambda k: (0, 0))

    in_specs = [
        pl.BlockSpec((g_pad, tile), lambda k: (0, k)),   # P tile (bf16 0/1)
        pl.BlockSpec((tile, f), lambda k: (k, 0)),       # X tile (bf16)
        _const(inv_counts.shape),
        _const(w1.shape), _const(b1.shape),
        _const(w2.shape), _const(b2.shape),
        _const(w3.shape), _const(b3.shape),
        _const(w4.shape), _const(b4.shape),
    ]
    out_spec = pl.BlockSpec((g_pad, w4.shape[1]), lambda k: (0, 0))

    return pl.pallas_call(
        _pool_mlp_kernel,
        out_shape=jax.ShapeDtypeStruct((g_pad, w4.shape[1]), jnp.float32),
        grid_spec=pltpu.PrefetchScalarGridSpec(
            num_scalar_prefetch=0, grid=(n_pad // tile,),
            in_specs=in_specs, out_specs=out_spec,
            scratch_shapes=[pltpu.VMEM((g_pad, f), jnp.float32)]),
        compiler_params=pltpu.CompilerParams(
            dimension_semantics=("arbitrary",),
            vmem_limit_bytes=_VMEM_LIMIT),
    )(pool_mat, x, inv_counts, w1, b1, w2, b2, w3, b3, w4, b4)


# ---------------------------------------------------------------------------
# Host-side graph metadata (data-dependent shapes -> built eagerly, outside jit)
# ---------------------------------------------------------------------------
def build_block_sparse_adj(edge_index, num_nodes, n_pad, tile):
    """Compact int8 (A+I) blocks, per-block (row,col) tile ids, and D^-1/2."""
    ei = np.asarray(jax.device_get(edge_index)).astype(np.int64)
    src, dst = ei[0], ei[1]

    # add_remaining_self_loops: add (i, i) only for nodes missing a self-loop
    has_self = np.zeros(num_nodes, dtype=bool)
    has_self[src[src == dst]] = True
    missing = np.nonzero(~has_self)[0]
    src = np.concatenate([src, missing])
    dst = np.concatenate([dst, missing])

    # deg over rows of (A+I); dinv = D^-1/2 (0 on padded / zero-degree rows)
    deg = np.bincount(dst, minlength=n_pad).astype(np.float32)
    dinv = np.where(deg > 0, 1.0 / np.sqrt(np.maximum(deg, 1.0)), 0.0)

    # unique nonzero (row-tile, col-tile) blocks, row-major sorted
    nbc = n_pad // tile
    key = (dst // tile) * nbc + (src // tile)
    uniq, inv = np.unique(key, return_inverse=True)
    n_blocks = uniq.shape[0]
    brow = (uniq // nbc).astype(np.int32)
    bcol = (uniq % nbc).astype(np.int32)

    blocks = np.zeros((n_blocks, tile, tile), dtype=np.int8)   # exact edge counts
    np.add.at(blocks, (inv, dst % tile, src % tile), 1)

    brow_ext = np.concatenate([brow, np.array([-1], np.int32)])  # sentinel row id
    return (jnp.asarray(blocks.reshape(n_blocks * tile, tile)),
            jnp.asarray(brow_ext), jnp.asarray(bcol),
            jnp.asarray(dinv[:, None], dtype=jnp.float32))


def build_pool(batch, num_graphs, g_pad, num_nodes, n_pad):
    b = np.full((n_pad,), -1, np.int64)
    b[:num_nodes] = np.asarray(jax.device_get(batch)).astype(np.int64)
    onehot = (b[None, :] == np.arange(g_pad)[:, None])            # [G_pad, N_pad] 0/1
    counts = onehot.sum(axis=1, keepdims=True).astype(np.float32)
    inv_counts = np.where(counts > 0, 1.0 / np.maximum(counts, 1.0), 0.0)
    return (jnp.asarray(onehot.astype(np.float32), dtype=jnp.bfloat16),
            jnp.asarray(inv_counts, dtype=jnp.float32))


# ---------------------------------------------------------------------------
# Parameter init (deterministic, glorot-uniform-like)
# ---------------------------------------------------------------------------
def _glorot(key, shape):
    fan_in, fan_out = shape
    limit = (6.0 / (fan_in + fan_out)) ** 0.5
    return jax.random.uniform(key, shape, jnp.float32, -limit, limit)


def init_params(key, in_channels, hidden_channels, mlp_channels):
    params = {"conv_w": [], "conv_b": [], "mlp_w": [], "mlp_b": []}
    dims = [in_channels] + hidden_channels
    keys = jax.random.split(key, 16)
    k = 0
    for i in range(len(hidden_channels)):
        params["conv_w"].append(_glorot(keys[k], (dims[i], dims[i + 1]))); k += 1
        params["conv_b"].append(jnp.zeros((1, dims[i + 1]), jnp.float32))
    for i in range(len(mlp_channels) - 1):
        params["mlp_w"].append(
            _glorot(keys[k], (mlp_channels[i], mlp_channels[i + 1]))); k += 1
        params["mlp_b"].append(jnp.zeros((1, mlp_channels[i + 1]), jnp.float32))
    return params


# ---------------------------------------------------------------------------
# Forward pass (metadata built eagerly; Pallas kernels do the heavy lifting)
# ---------------------------------------------------------------------------
def gcn_net_forward(params, x, edge_index, batch, *, num_graphs):
    x = jnp.asarray(x, jnp.float32)
    n = x.shape[0]
    tile = 512 if n >= 2048 else 256
    n_pad = _round_up(n, tile)
    g_pad = _round_up(num_graphs, 8)

    # block-sparse adjacency (int8 counts) + normalization + pooling matrices
    a_blocks, brow_ext, bcol, dinv = build_block_sparse_adj(edge_index, n, n_pad, tile)
    pool, inv_counts = build_pool(batch, num_graphs, g_pad, n, n_pad)

    # conv weights padded to lane-dense (x128) feature dims
    w1, w2 = params["conv_w"]
    b1, b2 = params["conv_b"]
    f1p = _round_up(w1.shape[1], 128)
    f2p = _round_up(w2.shape[1], 128)
    w1p = _pad2d(w1, w1.shape[0], f1p)                    # (Cin, f1p)  f32
    b1p = _pad2d(b1, 1, f1p)                              # (1, f1p)    f32
    w2p = _pad2d(w2, f1p, f2p).astype(jnp.bfloat16)       # (f1p, f2p)  bf16
    b2p = _pad2d(b2, 1, f2p)                              # (1, f2p)    f32

    # pre-scale X rows by D^-1/2 (column scaling of A folded out, exact in f32)
    x_scaled = _pad2d(x, n_pad, x.shape[1]) * dinv        # (n_pad, Cin) f32

    # keep the streamed operand VMEM-resident when it fits the per-copy budget
    resident = (n_pad * f2p * 2) <= _H_RESIDENT_BYTES

    # conv1 (+ fused layer-2 feature transform), output pre-scaled for conv2
    xw2_scaled = _conv1(a_blocks, brow_ext, bcol, x_scaled, dinv,
                        w1p, b1p, w2p, tile=tile, n_pad=n_pad, resident=resident)
    # conv2
    h2 = _conv2(a_blocks, brow_ext, bcol, xw2_scaled, dinv, b2p,
                tile=tile, n_pad=n_pad, resident=resident)

    # fused global_mean_pool + 4-layer MLP head (single pallas_call)
    mw, mb = params["mlp_w"], params["mlp_b"]
    w_m1 = _pad2d(mw[0], f2p, mw[0].shape[1])             # pad input rows to f2p
    out_pad = _round_up(mw[3].shape[1], 128)              # lane-dense final store
    w_m4 = _pad2d(mw[3], mw[3].shape[0], out_pad)
    b_m4 = _pad2d(mb[3], 1, out_pad)

    out_full = _pool_mlp(pool, h2, inv_counts,
                         (w_m1, mw[1], mw[2], w_m4),
                         (mb[0], mb[1], mb[2], b_m4), tile=tile)
    return out_full[:num_graphs, :mw[3].shape[1]]


# ---------------------------------------------------------------------------
if __name__ == "__main__":
    key = jax.random.PRNGKey(0)
    k_x, k_p = jax.random.split(key)

    in_channels = 4
    hidden_channels = [64, 128]
    mlp_channels = [128, 64, 64, 64, 1]

    num_nodes = 8
    num_graphs = 2

    # node features [N, C]
    x = jax.random.normal(k_x, (num_nodes, in_channels), jnp.float32)

    # two small graphs: nodes 0-3 (ring) and nodes 4-7 (ring), undirected edges
    src = jnp.array([0, 1, 1, 2, 2, 3, 3, 0, 4, 5, 5, 6, 6, 7, 7, 4], jnp.int32)
    dst = jnp.array([1, 0, 2, 1, 3, 2, 0, 3, 5, 4, 6, 5, 7, 6, 4, 7], jnp.int32)
    edge_index = jnp.stack([src, dst], axis=0)            # [2, E]

    batch = jnp.array([0, 0, 0, 0, 1, 1, 1, 1], jnp.int32)  # [N]

    params = init_params(k_p, in_channels, hidden_channels, mlp_channels)

    # NOTE: not wrapped in a single jax.jit — the block-sparsity metadata is
    # data-dependent (host-side); the Pallas kernels themselves are compiled.
    out = gcn_net_forward(params, x, edge_index, batch, num_graphs=num_graphs)
    out = jax.block_until_ready(out)
    assert out.shape == (num_graphs, 1)
    print("KERNEL_OK")
</pallas_src>

<mosaic_0001>
module attributes {stable_mosaic.version = 11 : i64} {
  func.func @_conv1_kernel(%arg0: i32, %arg1: memref<2xi32, #tpu.memory_space<smem>>, %arg2: memref<1xi32, #tpu.memory_space<smem>>, %arg3: memref<256x256xi8, #tpu.memory_space<vmem>>, %arg4: memref<256x4xf32, #tpu.memory_space<vmem>>, %arg5: memref<256x1xf32, #tpu.memory_space<vmem>>, %arg6: memref<4x128xf32, #tpu.memory_space<vmem>>, %arg7: memref<1x128xf32, #tpu.memory_space<vmem>>, %arg8: memref<128x128xbf16, #tpu.memory_space<vmem>>, %arg9: memref<256x128xbf16, #tpu.memory_space<vmem>>, %arg10: memref<256x128xf32, #tpu.memory_space<vmem>>) attributes {dimension_semantics = [#tpu.dimension_semantics<arbitrary>], iteration_bounds = array<i64: 1>, scalar_prefetch = 2 : i64, scratch_operands = 1 : i64, tpu.core_type = #tpu.core_type<tc>, window_params = [{transform_indices = @transform_0, window_bounds = array<i64: 256, 256>}, {pipeline_mode = #tpu.pipeline_mode<synchronous>, transform_indices = @transform_1, window_bounds = array<i64: 256, 4>}, {transform_indices = @transform_2, window_bounds = array<i64: 256, 1>}, {pipeline_mode = #tpu.pipeline_mode<synchronous>, transform_indices = @transform_3, window_bounds = array<i64: 4, 128>}, {pipeline_mode = #tpu.pipeline_mode<synchronous>, transform_indices = @transform_4, window_bounds = array<i64: 1, 128>}, {pipeline_mode = #tpu.pipeline_mode<synchronous>, transform_indices = @transform_5, window_bounds = array<i64: 128, 128>}, {transform_indices = @transform_6, window_bounds = array<i64: 256, 128>}]} {
    %0 = arith.index_cast %arg0 : i32 to index
    %1 = memref.load %arg1[%0] : memref<2xi32, #tpu.memory_space<smem>>
    %c0_i32 = arith.constant 0 : i32
    %2 = arith.cmpi eq, %arg0, %c0_i32 : i32
    %c1_i32 = arith.constant 1 : i32
    %3 = arith.subi %arg0, %c1_i32 : i32
    %c0_i32_0 = arith.constant 0 : i32
    %4 = arith.maxsi %3, %c0_i32_0 : i32
    %5 = arith.index_cast %4 : i32 to index
    %6 = memref.load %arg1[%5] : memref<2xi32, #tpu.memory_space<smem>>
    %7 = arith.cmpi ne, %1, %6 : i32
    %8 = arith.ori %2, %7 : i1
    %c1_i32_1 = arith.constant 1 : i32
    %9 = arith.addi %arg0, %c1_i32_1 : i32
    %10 = arith.index_cast %9 : i32 to index
    %11 = memref.load %arg1[%10] : memref<2xi32, #tpu.memory_space<smem>>
    %12 = arith.cmpi ne, %1, %11 : i32
    %13 = arith.extui %8 : i1 to i32
    %c0_i32_2 = arith.constant 0 : i32
    %14 = arith.cmpi ne, %13, %c0_i32_2 : i32
    scf.if %14 {
      %cst_13 = arith.constant 0.000000e+00 : f32
      %33 = vector.broadcast %cst_13 : f32 to vector<256x128xf32>
      %c0_14 = arith.constant 0 : index
      %c0_15 = arith.constant 0 : index
      %34 = vector.load %arg10[%c0_14, %c0_15] : memref<256x128xf32, #tpu.memory_space<vmem>>, vector<256x128xf32>
      tpu.vector_store %arg10[%c0_14, %c0_15], %33 {strides = array<i32>} : memref<256x128xf32, #tpu.memory_space<vmem>>, vector<256x128xf32>,
    } else {
    }
    %15 = arith.index_cast %arg0 : i32 to index
    %16 = memref.load %arg2[%15] : memref<1xi32, #tpu.memory_space<smem>>
    %c256_i32 = arith.constant 256 : i32
    %17 = arith.muli %16, %c256_i32 : i32
    %18 = tpu.assume_multiple %17, 256 : i32
    %19 = arith.index_cast %18 : i32 to index
    %c0 = arith.constant 0 : index
    %20 = vector.load %arg4[%19, %c0] : memref<256x4xf32, #tpu.memory_space<vmem>>, vector<256x4xf32>
    %c0_3 = arith.constant 0 : index
    %c0_4 = arith.constant 0 : index
    %21 = vector.load %arg6[%c0_3, %c0_4] : memref<4x128xf32, #tpu.memory_space<vmem>>, vector<4x128xf32>
    %cst = arith.constant dense<0.000000e+00> : vector<256x128xf32>
    %22 = tpu.matmul %20, %21, %cst {dimension_numbers = #tpu.dot_dimension_numbers<[1], [0], [0], [1], [0, 0, 1, 1], [], []>} : vector<256x4xf32>, vector<4x128xf32>, vector<256x128xf32> -> vector<256x128xf32>
    %c0_5 = arith.constant 0 : index
    %c0_6 = arith.constant 0 : index
    %23 = vector.load %arg3[%c0_5, %c0_6] : memref<256x256xi8, #tpu.memory_space<vmem>>, vector<256x256xi8>
    %24 = arith.sitofp %23 : vector<256x256xi8> to vector<256x256xf32>
    %25 = arith.truncf %24 : vector<256x256xf32> to vector<256x256xbf16>
    %c0_7 = arith.constant 0 : index
    %c0_8 = arith.constant 0 : index
    %26 = vector.load %arg10[%c0_7, %c0_8] : memref<256x128xf32, #tpu.memory_space<vmem>>, vector<256x128xf32>
    %27 = arith.truncf %22 : vector<256x128xf32> to vector<256x128xbf16>
    %cst_9 = arith.constant dense<0.000000e+00> : vector<256x128xf32>
    %28 = tpu.matmul %25, %27, %cst_9 {dimension_numbers = #tpu.dot_dimension_numbers<[1], [0], [0], [1], [0, 0, 1, 1], [], []>} : vector<256x256xbf16>, vector<256x128xbf16>, vector<256x128xf32> -> vector<256x128xf32>
    %29 = arith.addf %26, %28 : vector<256x128xf32>
    %c0_10 = arith.constant 0 : index
    %c0_11 = arith.constant 0 : index
    %30 = vector.load %arg10[%c0_10, %c0_11] : memref<256x128xf32, #tpu.memory_space<vmem>>, vector<256x128xf32>
    tpu.vector_store %arg10[%c0_10, %c0_11], %29 {strides = array<i32>} : memref<256x128xf32, #tpu.memory_space<vmem>>, vector<256x128xf32>,
    %31 = arith.extui %12 : i1 to i32
    %c0_i32_12 = arith.constant 0 : i32
    %32 = arith.cmpi ne, %31, %c0_i32_12 : i32
    scf.if %32 {
      %c0_13 = arith.constant 0 : index
      %c0_14 = arith.constant 0 : index
      %33 = vector.load %arg5[%c0_13, %c0_14] : memref<256x1xf32, #tpu.memory_space<vmem>>, vector<256x1xf32>
      %c0_15 = arith.constant 0 : index
      %c0_16 = arith.constant 0 : index
      %34 = vector.load %arg10[%c0_15, %c0_16] : memref<256x128xf32, #tpu.memory_space<vmem>>, vector<256x128xf32>
      %35 = vector.broadcast %33 : vector<256x1xf32> to vector<256x128xf32>
      %36 = arith.mulf %35, %34 : vector<256x128xf32>
      %c0_17 = arith.constant 0 : index
      %c0_18 = arith.constant 0 : index
      %37 = vector.load %arg7[%c0_17, %c0_18] : memref<1x128xf32, #tpu.memory_space<vmem>>, vector<1x128xf32>
      %38 = vector.broadcast %37 : vector<1x128xf32> to vector<256x128xf32>
      %39 = arith.addf %36, %38 : vector<256x128xf32>
      %cst_19 = arith.constant 0.000000e+00 : f32
      %40 = vector.broadcast %cst_19 : f32 to vector<256x128xf32>
      %41 = arith.maximumf %39, %40 : vector<256x128xf32>
      %42 = arith.truncf %41 : vector<256x128xf32> to vector<256x128xbf16>
      %c0_20 = arith.constant 0 : index
      %c0_21 = arith.constant 0 : index
      %43 = vector.load %arg8[%c0_20, %c0_21] : memref<128x128xbf16, #tpu.memory_space<vmem>>, vector<128x128xbf16>
      %cst_22 = arith.constant dense<0.000000e+00> : vector<256x128xf32>
      %44 = tpu.matmul %42, %43, %cst_22 {dimension_numbers = #tpu.dot_dimension_numbers<[1], [0], [0], [1], [0, 0, 1, 1], [], []>} : vector<256x128xbf16>, vector<128x128xbf16>, vector<256x128xf32> -> vector<256x128xf32>
      %45 = vector.broadcast %33 : vector<256x1xf32> to vector<256x128xf32>
      %46 = arith.mulf %45, %44 : vector<256x128xf32>
      %47 = arith.truncf %46 : vector<256x128xf32> to vector<256x128xbf16>
      %c0_23 = arith.constant 0 : index
      %c0_24 = arith.constant 0 : index
      %48 = vector.load %arg9[%c0_23, %c0_24] : memref<256x128xbf16, #tpu.memory_space<vmem>>, vector<256x128xbf16>
      tpu.vector_store %arg9[%c0_23, %c0_24], %47 {strides = array<i32>} : memref<256x128xbf16, #tpu.memory_space<vmem>>, vector<256x128xbf16>,
    } else {
    }
    return
  }
  func.func @transform_0(%arg0: i32, %arg1: memref<2xi32, #tpu.memory_space<smem>>, %arg2: memref<1xi32, #tpu.memory_space<smem>>) -> (i32, i32) {
    %c0_i32 = arith.constant 0 : i32
    %c0_i32_0 = arith.constant 0 : i32
    return %arg0, %c0_i32 : i32, i32
  }
  func.func @transform_1(%arg0: i32, %arg1: memref<2xi32, #tpu.memory_space<smem>>, %arg2: memref<1xi32, #tpu.memory_space<smem>>) -> (i32, i32) {
    %c0_i32 = arith.constant 0 : i32
    %c0_i32_0 = arith.constant 0 : i32
    %c0_i32_1 = arith.constant 0 : i32
    return %c0_i32, %c0_i32_0 : i32, i32
  }
  func.func @transform_2(%arg0: i32, %arg1: memref<2xi32, #tpu.memory_space<smem>>, %arg2: memref<1xi32, #tpu.memory_space<smem>>) -> (i32, i32) {
    %0 = arith.index_cast %arg0 : i32 to index
    %1 = memref.load %arg1[%0] : memref<2xi32, #tpu.memory_space<smem>>
    %c0_i32 = arith.constant 0 : i32
    %c0_i32_0 = arith.constant 0 : i32
    return %1, %c0_i32 : i32, i32
  }
  func.func @transform_3(%arg0: i32, %arg1: memref<2xi32, #tpu.memory_space<smem>>, %arg2: memref<1xi32, #tpu.memory_space<smem>>) -> (i32, i32) {
    %c0_i32 = arith.constant 0 : i32
    %c0_i32_0 = arith.constant 0 : i32
    %c0_i32_1 = arith.constant 0 : i32
    return %c0_i32, %c0_i32_0 : i32, i32
  }
  func.func @transform_4(%arg0: i32, %arg1: memref<2xi32, #tpu.memory_space<smem>>, %arg2: memref<1xi32, #tpu.memory_space<smem>>) -> (i32, i32) {
    %c0_i32 = arith.constant 0 : i32
    %c0_i32_0 = arith.constant 0 : i32
    %c0_i32_1 = arith.constant 0 : i32
    return %c0_i32, %c0_i32_0 : i32, i32
  }
  func.func @transform_5(%arg0: i32, %arg1: memref<2xi32, #tpu.memory_space<smem>>, %arg2: memref<1xi32, #tpu.memory_space<smem>>) -> (i32, i32) {
    %c0_i32 = arith.constant 0 : i32
    %c0_i32_0 = arith.constant 0 : i32
    %c0_i32_1 = arith.constant 0 : i32
    return %c0_i32, %c0_i32_0 : i32, i32
  }
  func.func @transform_6(%arg0: i32, %arg1: memref<2xi32, #tpu.memory_space<smem>>, %arg2: memref<1xi32, #tpu.memory_space<smem>>) -> (i32, i32) {
    %0 = arith.index_cast %arg0 : i32 to index
    %1 = memref.load %arg1[%0] : memref<2xi32, #tpu.memory_space<smem>>
    %c0_i32 = arith.constant 0 : i32
    %c0_i32_0 = arith.constant 0 : i32
    return %1, %c0_i32 : i32, i32
  }
}

</mosaic_0001>

<bundles_post_ra>
// kernel: tpu_custom_call.1
= control target key start
LH: loop header
LB: loop body
LE: loop exit
PB: predicated region body
PF: predicated region fallthrough
CT: control target
= control target key end

     0   :  { %s2570_s0 = inlined_call_operand.vmem [shape: s32[2], index: 0, kind: input, shape index: {}]   ;;  %s2571_s1 = inlined_call_operand.<no memory space> [shape: s32[1], index: 1, kind: input, shape index: {}]   ;;  %s2572_s2 = inlined_call_operand.vmem [shape: s8[256,256], index: 2, kind: input, shape index: {}]   ;;  %s2573_s3 = inlined_call_operand.vmem [shape: f32[256,4], index: 3, kind: input, shape index: {}]   ;;  %s2574_s4 = inlined_call_operand.vmem [shape: f32[256,1], index: 4, kind: input, shape index: {}]   ;;  %s2575_s5 = inlined_call_operand.vmem [shape: f32[4,128], index: 5, kind: input, shape index: {}]   ;;  %s2576_s6 = inlined_call_operand.vmem [shape: f32[1,128], index: 6, kind: input, shape index: {}]   ;;  %s2577_s7 = inlined_call_operand.vmem [shape: bf16[128,128], index: 7, kind: input, shape index: {}]   ;;  %s2578_s8 = inlined_call_operand.hbm [shape: bf16[256,128], index: 8, kind: output, shape index: {}]  }
   0x1   :  { %s13_s29 = sshll.u32 %s2570_s0, 4  ;;  %s14_s29 = int_to_ptr.vmem [resolvable:$true] %s13_s29 }
   0x2   :  { %s2104_s30 = scalar_lea.vmem %s14_s29, 16  ;;  %p2109_p1 = scmp.lt.s32.totalorder %s14_s29, %s14_s29 }
   0x3   :  { %p2105_p0 = scmp.ne.s32.totalorder %s14_s29, %s2104_s30  ;;  %p2110_p2 = scmp.lt.s32.totalorder %s2104_s30, %s2104_s30 }
   0x5   :  { %p2111_p3 = por %p2110_p2, %p2109_p1 }
   0x7   :  { %p2112_p4 = pnand %p2111_p3, %p2105_p0 }
   0x9   :  { %2115 = shalt.err (!%p2112_p4)  }
   0xa   :  { %s2144_s9 = smov [#allocation4]  }
   0xb   :  { %16 = dma.vmem_to_smem %s14_s29, 16, %s2144_s9, [#allocation3] }
   0xc   :  { %2140 = dma.done.wait [#allocation3], 16 }
   0xd   :  { %2141 = vsyncadd [#allocation3], 4294967280 }
   0xe   :  { %19 = sfence }
   0xf   :  { %20 = vsyncpa [#allocation7], 0  ;;  %s2197_s10 = sld [smem:[#allocation4]]  ;;  %s2199_s11 = sld [smem:[#allocation4 + $0x1]]  ;;  %v139_v0 = vld [vmem:[%s2575_s5] sm:$0xf] }
  0x10   :  { %vm237_vm0 = vcmask 1043456   ;;  %s1583_s15 = sshll.u32 %s2571_s1, 8  ;;  %vm140_vm1 = vcmask 31744   ;;  %v2285_v33 = vld [vmem:[%s2572_s2 + $0x28] sm:$0xff] }
  0x11   :  { %1958 = vmatprep.subr.msk.mxu0 %vm237_vm0, %v139_v0  ;;  %s2210_s18 = scalar_lea.vmem %s2573_s3, %s1583_s15  ;;  %v493_v34 = vunpack.c.h.s8.bf16 %v2285_v33  ;;  %v2291_v35 = vld [vmem:[%s2572_s2 + $0x8] sm:$0xff] }
  0x12   :  { %1959 = vmatpush3.msk.msra.mxu0 %vm237_vm0, %v139_v0  ;;  %v107_v1 = vld [vmem:[%s2210_s18] sm:$0xff]  ;;  %v108_v2 = vld [vmem:[%s2210_s18 + $0x8] sm:$0xff]  ;;  %v109_v3 = vld [vmem:[%s2210_s18 + $0x10] sm:$0xff]  ;;  %v483_v36 = vunpack.c.l.s8.bf16 %v2291_v35 }
  0x13   :  { %1960 = vmatprep.mubr.msk.f32.mxu0 %vm140_vm1, %v107_v1  ;;  %v110_v4 = vld [vmem:[%s2210_s18 + $0x18] sm:$0xff]  ;;  %v111_v5 = vld [vmem:[%s2210_s18 + $0x20] sm:$0xff]  ;;  %v112_v6 = vld [vmem:[%s2210_s18 + $0x28] sm:$0xff]  ;;  %634 = vmatprep.mubr.bf16.mxu1 %v493_v34 }
  0x14   :  { %1961 = vmatmul.mubr.msk.f32.vlgmr.msra.gmra.mrb[0].mxu0 %vm140_vm1, %v108_v2  ;;  %v113_v7 = vld [vmem:[%s2210_s18 + $0x30] sm:$0xff]  ;;  %v114_v8 = vld [vmem:[%s2210_s18 + $0x38] sm:$0xff]  ;;  %v115_v9 = vld [vmem:[%s2210_s18 + $0x40] sm:$0xff] }
  0x15   :  { %s1580_s1 = sshll.u32 %s2197_s10, 5  ;;  %1963 = vmatprep.mubr.msk.f32.mxu0 %vm140_vm1, %v109_v3  ;;  %v116_v10 = vld [vmem:[%s2210_s18 + $0x48] sm:$0xff]  ;;  %v117_v11 = vld [vmem:[%s2210_s18 + $0x50] sm:$0xff]  ;;  %v118_v12 = vld [vmem:[%s2210_s18 + $0x58] sm:$0xff]  ;;  %p1617_p6 = scmp.eq.s32.totalorder %s2197_s10, %s2199_s11 }
  0x16   :  { %p49_p5 = scmp.lt.s32.totalorder %s1580_s1, 31  ;;  %v119_v13 = vld [vmem:[%s2210_s18 + $0x60] sm:$0xff]  ;;  %v120_v14 = vld [vmem:[%s2210_s18 + $0x68] sm:$0xff]  ;;  %v121_v15 = vld [vmem:[%s2210_s18 + $0x70] sm:$0xff] }
  0x17   :  { %v122_v16 = vld [vmem:[%s2210_s18 + $0x78] sm:$0xff]  ;;  %v123_v17 = vld [vmem:[%s2210_s18 + $0x80] sm:$0xff]  ;;  %v124_v18 = vld [vmem:[%s2210_s18 + $0x88] sm:$0xff] }
  0x18   :  { %s2580_s1 = smov (!%p49_p5, %s1580_s1), 31  ;;  %1964 = vmatmul.mubr.msk.f32.gmra.mrb[2].mxu0 %vm140_vm1, %v110_v4  ;;  %v125_v19 = vld [vmem:[%s2210_s18 + $0x90] sm:$0xff]  ;;  %v126_v20 = vld [vmem:[%s2210_s18 + $0x98] sm:$0xff]  ;;  %v127_v21 = vld [vmem:[%s2210_s18 + $0xa0] sm:$0xff] }
  0x19   :  { %1966 = vmatprep.mubr.msk.f32.mxu0 %vm140_vm1, %v111_v5  ;;  %s1581_s3 = sshll.u32 %s2580_s1, 3  ;;  %v128_v22 = vld [vmem:[%s2210_s18 + $0xa8] sm:$0xff]  ;;  %v129_v23 = vld [vmem:[%s2210_s18 + $0xb0] sm:$0xff]  ;;  %v130_v24 = vld [vmem:[%s2210_s18 + $0xb8] sm:$0xff] }
  0x1a   :  { %s2228_s20 = scalar_lea.vmem %s2574_s4, %s1581_s3  ;;  %v131_v25 = vld [vmem:[%s2210_s18 + $0xc0] sm:$0xff]  ;;  %v132_v26 = vld [vmem:[%s2210_s18 + $0xc8] sm:$0xff]  ;;  %v133_v27 = vld [vmem:[%s2210_s18 + $0xd0] sm:$0xff] }
  0x1b   :  { %v134_v28 = vld [vmem:[%s2210_s18 + $0xd8] sm:$0xff]  ;;  %v135_v29 = vld [vmem:[%s2210_s18 + $0xe0] sm:$0xff]  ;;  %v136_v30 = vld [vmem:[%s2210_s18 + $0xe8] sm:$0xff] }
  0x1c   :  { %1967 = vmatmul.mubr.msk.f32.gmra.mrb[4].mxu0 %vm140_vm1, %v112_v6  ;;  %v137_v31 = vld [vmem:[%s2210_s18 + $0xf0] sm:$0xff]  ;;  %v138_v32 = vld [vmem:[%s2210_s18 + $0xf8] sm:$0xff] }
  0x1d   :  { %1969 = vmatprep.mubr.msk.f32.mxu0 %vm140_vm1, %v113_v7 }
  0x20   :  { %1970 = vmatmul.mubr.msk.f32.gmra.mrb[6].mxu0 %vm140_vm1, %v114_v8 }
  0x21   :  { %1972 = vmatprep.mubr.msk.f32.mxu0 %vm140_vm1, %v115_v9 }
  0x24   :  { %1973 = vmatmul.mubr.msk.f32.gmra.mrb[8].mxu0 %vm140_vm1, %v116_v10 }
  0x25   :  { %1975 = vmatprep.mubr.msk.f32.mxu0 %vm140_vm1, %v117_v11 }
  0x28   :  { %1976 = vmatmul.mubr.msk.f32.gmra.mrb[10].mxu0 %vm140_vm1, %v118_v12 }
  0x29   :  { %1978 = vmatprep.mubr.msk.f32.mxu0 %vm140_vm1, %v119_v13 }
  0x2c   :  { %1979 = vmatmul.mubr.msk.f32.gmra.mrb[12].mxu0 %vm140_vm1, %v120_v14 }
  0x2d   :  { %1981 = vmatprep.mubr.msk.f32.mxu0 %vm140_vm1, %v121_v15 }
  0x30   :  { %1982 = vmatmul.mubr.msk.f32.gmra.mrb[14].mxu0 %vm140_vm1, %v122_v16 }
  0x31   :  { %1984 = vmatprep.mubr.msk.f32.mxu0 %vm140_vm1, %v123_v17 }
  0x34   :  { %1985 = vmatmul.mubr.msk.f32.gmra.mrb[16].mxu0 %vm140_vm1, %v124_v18 }
  0x35   :  { %1987 = vmatprep.mubr.msk.f32.mxu0 %vm140_vm1, %v125_v19 }
  0x38   :  { %1988 = vmatmul.mubr.msk.f32.gmra.mrb[18].mxu0 %vm140_vm1, %v126_v20  ;;  %v470_v20 = vld [vmem:[%s2572_s2 + $0x20] sm:$0xff] }
  0x39   :  { %1990 = vmatprep.mubr.msk.f32.mxu0 %vm140_vm1, %v127_v21  ;;  %v466_v21 = vld [vmem:[%s2572_s2] sm:$0xff] }
  0x3c   :  { %1991 = vmatmul.mubr.msk.f32.gmra.mrb[20].mxu0 %vm140_vm1, %v128_v22 }
  0x3d   :  { %1993 = vmatprep.mubr.msk.f32.mxu0 %vm140_vm1, %v129_v23  ;;  %v473_v23 = vld [vmem:[%s2572_s2 + $0x38] sm:$0xff] }
  0x40   :  { %1994 = vmatmul.mubr.msk.f32.gmra.mrb[22].mxu0 %vm140_vm1, %v130_v24  ;;  %v492_v24 = vunpack.c.h.s8.bf16 %v470_v20 }
  0x41   :  { %1996 = vmatprep.mubr.msk.f32.mxu0 %vm140_vm1, %v131_v25  ;;  %v482_v25 = vunpack.c.l.s8.bf16 %v466_v21 }
  0x44   :  { %1997 = vmatmul.mubr.msk.f32.gmra.mrb[24].mxu0 %vm140_vm1, %v132_v26  ;;  %v495_v26 = vunpack.c.l.s8.bf16 %v473_v23 }
  0x45   :  { %1999 = vmatprep.mubr.msk.f32.mxu0 %vm140_vm1, %v133_v27  ;;  %v485_v27 = vunpack.c.h.s8.bf16 %v2291_v35  ;;  %v468_v35 = vld [vmem:[%s2572_s2 + $0x10] sm:$0xff] }
  0x48   :  { %2000 = vmatmul.mubr.msk.f32.gmra.mrb[26].mxu0 %vm140_vm1, %v134_v28  ;;  %v472_v28 = vld [vmem:[%s2572_s2 + $0x30] sm:$0xff] }
  0x49   :  { %2002 = vmatprep.mubr.msk.f32.mxu0 %vm140_vm1, %v135_v29  ;;  %v469_v29 = vld [vmem:[%s2572_s2 + $0x18] sm:$0xff] }
  0x4a   :  { %v487_v34 = vunpack.c.l.s8.bf16 %v469_v29 }
  0x4c   :  { %2003 = vmatmul.mubr.msk.f32.gmra.mrb[28].mxu0 %vm140_vm1, %v136_v30  ;;  %v494_v30 = vunpack.c.l.s8.bf16 %v472_v28 }
  0x4d   :  { %2005 = vmatprep.mubr.msk.f32.mxu0 %vm140_vm1, %v137_v31  ;;  %v484_v31 = vunpack.c.h.s8.bf16 %v466_v21 }
  0x50   :  { %2006 = vmatmul.mubr.msk.f32.gmra.mrb[30].mxu0 %vm140_vm1, %v138_v32  ;;  %v497_v32 = vunpack.c.h.s8.bf16 %v473_v23 }
  0x51   :  { %594 = vmatprep.mubr.bf16.mxu0 %v483_v36  ;;  %v475_v36 = vld [vmem:[%s2572_s2 + $0x48] sm:$0xff] }
  0xe7   :  { %v1962_v37 = vpop.f32.mrb[0].mxu0 }
  0xe8   :  { %v307_v38 = vpop.f32.mrb[1].mxu0 }
  0xe9   :  { %v546_v39 = vpack.c.bf16 %v1962_v37, %v307_v38  ;;  %v496_v37 = vunpack.c.h.s8.bf16 %v472_v28  ;;  %v486_v38 = vunpack.c.l.s8.bf16 %v468_v35 }
  0xeb   :  { %v1965_v40 = vpop.f32.mrb[2].mxu0 }
  0xec   :  { %v317_v41 = vpop.f32.mrb[3].mxu0 }
  0xed   :  { %v547_v42 = vpack.c.bf16 %v1965_v40, %v317_v41  ;;  %v489_v40 = vunpack.c.h.s8.bf16 %v469_v29  ;;  %v474_v41 = vld [vmem:[%s2572_s2 + $0x40] sm:$0xff] }
  0xef   :  { %v1968_v43 = vpop.f32.mrb[4].mxu0 }
  0xf0   :  { %v327_v44 = vpop.f32.mrb[5].mxu0 }
  0xf1   :  { %v548_v45 = vpack.c.bf16 %v1968_v43, %v327_v44  ;;  %v488_v43 = vunpack.c.h.s8.bf16 %v468_v35  ;;  %v491_v44 = vunpack.c.l.s8.bf16 %v2285_v33 }
  0xf3   :  { %v1971_v46 = vpop.f32.mrb[6].mxu0 }
  0xf4   :  { %v337_v47 = vpop.f32.mrb[7].mxu0 }
  0xf5   :  { %v549_v48 = vpack.c.bf16 %v1971_v46, %v337_v47  ;;  %v477_v46 = vld [vmem:[%s2572_s2 + $0x58] sm:$0xff]  ;;  %v500_v47 = vunpack.c.h.s8.bf16 %v474_v41 }
  0xf7   :  { %v1974_v49 = vpop.f32.mrb[8].mxu0 }
  0xf8   :  { %v347_v50 = vpop.f32.mrb[9].mxu0 }
  0xf9   :  { %v550_v51 = vpack.c.bf16 %v1974_v49, %v347_v50  ;;  %v503_v49 = vunpack.c.l.s8.bf16 %v477_v46  ;;  %v476_v50 = vld [vmem:[%s2572_s2 + $0x50] sm:$0xff] }
  0xfa   :  { %v502_v33 = vunpack.c.l.s8.bf16 %v476_v50 }
  0xfb   :  { %v1977_v52 = vpop.f32.mrb[10].mxu0 }
  0xfc   :  { %v357_v53 = vpop.f32.mrb[11].mxu0 }
  0xfd   :  { %v551_v54 = vpack.c.bf16 %v1977_v52, %v357_v53  ;;  %v479_v52 = vld [vmem:[%s2572_s2 + $0x68] sm:$0xff]  ;;  %v504_v53 = vunpack.c.h.s8.bf16 %v476_v50 }
  0xff   :  { %v1980_v55 = vpop.f32.mrb[12].mxu0 }
 0x100   :  { %v367_v56 = vpop.f32.mrb[13].mxu0 }
 0x101   :  { %v552_v57 = vpack.c.bf16 %v1980_v55, %v367_v56  ;;  %v478_v55 = vld [vmem:[%s2572_s2 + $0x60] sm:$0xff] }
 0x102   :  { %v506_v56 = vunpack.c.l.s8.bf16 %v478_v55 }
 0x103   :  { %v1983_v58 = vpop.f32.mrb[14].mxu0 }
 0x104   :  { %v377_v59 = vpop.f32.mrb[15].mxu0 }
 0x105   :  { %v553_v60 = vpack.c.bf16 %v1983_v58, %v377_v59  ;;  %v481_v58 = vld [vmem:[%s2572_s2 + $0x78] sm:$0xff]  ;;  %v508_v59 = vunpack.c.h.s8.bf16 %v478_v55 }
 0x107   :  { %v1986_v61 = vpop.f32.mrb[16].mxu0 }
 0x108   :  { %v387_v62 = vpop.f32.mrb[17].mxu0 }
 0x109   :  { %v554_v63 = vpack.c.bf16 %v1986_v61, %v387_v62  ;;  %v480_v61 = vld [vmem:[%s2572_s2 + $0x70] sm:$0xff] }
 0x10a   :  { %v510_v62 = vunpack.c.l.s8.bf16 %v480_v61 }
 0x10b   :  { %v1989_v0 = vpop.f32.mrb[18].mxu0  ;;  %1822 = vmatprep.subr.bf16.mxu0 %v554_v63  ;;  %2056 = vmatprep.subr.bf16.mxu1 %v554_v63  ;;  %v513_v63 = vunpack.c.h.s8.bf16 %v481_v58 }
 0x10c   :  { %v397_v1 = vpop.f32.mrb[19].mxu0  ;;  %1823 = vmatpush3.bf16.msra.mxu0 %v546_v39  ;;  %2064 = vmatpush3.bf16.msra.mxu1 %v546_v39  ;;  %v499_v39 = vunpack.c.l.s8.bf16 %v475_v36 }
 0x10d   :  { %v555_v2 = vpack.c.bf16 %v1989_v0, %v397_v1  ;;  %v512_v0 = vunpack.c.h.s8.bf16 %v480_v61 }
 0x10f   :  { %v1992_v3 = vpop.f32.mrb[20].mxu0  ;;  %1824 = vmatprep.subr.bf16.mxu0 %v555_v2  ;;  %2057 = vmatprep.subr.bf16.mxu1 %v555_v2 }
 0x110   :  { %v407_v4 = vpop.f32.mrb[21].mxu0  ;;  %1825 = vmatpush3.bf16.msra.mxu0 %v547_v42  ;;  %2065 = vmatpush3.bf16.msra.mxu1 %v547_v42  ;;  %v498_v42 = vunpack.c.l.s8.bf16 %v474_v41 }
 0x111   :  { %v556_v5 = vpack.c.bf16 %v1992_v3, %v407_v4 }
 0x113   :  { %v1995_v6 = vpop.f32.mrb[22].mxu0  ;;  %1826 = vmatprep.subr.bf16.mxu0 %v556_v5  ;;  %2058 = vmatprep.subr.bf16.mxu1 %v556_v5 }
 0x114   :  { %v417_v7 = vpop.f32.mrb[23].mxu0  ;;  %1827 = vmatpush3.bf16.msra.mxu0 %v548_v45  ;;  %2066 = vmatpush3.bf16.msra.mxu1 %v548_v45  ;;  %v501_v45 = vunpack.c.h.s8.bf16 %v475_v36 }
 0x115   :  { %v557_v8 = vpack.c.bf16 %v1995_v6, %v417_v7 }
 0x117   :  { %v1998_v9 = vpop.f32.mrb[24].mxu0  ;;  %1828 = vmatprep.subr.bf16.mxu0 %v557_v8  ;;  %2059 = vmatprep.subr.bf16.mxu1 %v557_v8 }
 0x118   :  { %v427_v10 = vpop.f32.mrb[25].mxu0  ;;  %1829 = vmatpush3.bf16.msra.mxu0 %v549_v48  ;;  %2067 = vmatpush3.bf16.msra.mxu1 %v549_v48  ;;  %v490_v48 = vunpack.c.l.s8.bf16 %v470_v20 }
 0x119   :  { %v558_v11 = vpack.c.bf16 %v1998_v9, %v427_v10 }
 0x11b   :  { %v2001_v12 = vpop.f32.mrb[26].mxu0  ;;  %1830 = vmatprep.subr.bf16.mxu0 %v558_v11  ;;  %2060 = vmatprep.subr.bf16.mxu1 %v558_v11 }
 0x11c   :  { %v437_v13 = vpop.f32.mrb[27].mxu0  ;;  %1831 = vmatpush3.bf16.msra.mxu0 %v550_v51  ;;  %2068 = vmatpush3.bf16.msra.mxu1 %v550_v51  ;;  %v505_v51 = vunpack.c.h.s8.bf16 %v477_v46 }
 0x11d   :  { %v559_v14 = vpack.c.bf16 %v2001_v12, %v437_v13 }
 0x11f   :  { %v2004_v15 = vpop.f32.mrb[28].mxu0  ;;  %1832 = vmatprep.subr.bf16.mxu0 %v559_v14  ;;  %2061 = vmatprep.subr.bf16.mxu1 %v559_v14 }
 0x120   :  { %v447_v16 = vpop.f32.mrb[29].mxu0  ;;  %1833 = vmatpush3.bf16.msra.mxu0 %v551_v54  ;;  %2069 = vmatpush3.bf16.msra.mxu1 %v551_v54  ;;  %v507_v54 = vunpack.c.l.s8.bf16 %v479_v52 }
 0x121   :  { %v560_v17 = vpack.c.bf16 %v2004_v15, %v447_v16 }
 0x123   :  { %v2007_v18 = vpop.f32.mrb[30].mxu0  ;;  %1834 = vmatprep.subr.bf16.mxu0 %v560_v17  ;;  %2062 = vmatprep.subr.bf16.mxu1 %v560_v17 }
 0x124   :  { %v457_v19 = vpop.f32.mrb[31].mxu0  ;;  %1835 = vmatpush3.bf16.msra.mxu0 %v552_v57  ;;  %2070 = vmatpush3.bf16.msra.mxu1 %v552_v57  ;;  %v509_v57 = vunpack.c.h.s8.bf16 %v479_v52 }
 0x125   :  { %v561_v22 = vpack.c.bf16 %v2007_v18, %v457_v19 }
 0x127   :  { %1836 = vmatprep.subr.bf16.mxu0 %v561_v22  ;;  %2063 = vmatprep.subr.bf16.mxu1 %v561_v22 }
 0x128   :  { %1837 = vmatpush3.bf16.msra.mxu0 %v553_v60  ;;  %2071 = vmatpush3.bf16.msra.mxu1 %v553_v60  ;;  %v511_v60 = vunpack.c.l.s8.bf16 %v481_v58 }
 0x12b   :  { %635 = vmatmul.mubr.bf16.vlgmr.msra.gmra.mrb[0].mxu1 %v492_v24  ;;  %595 = vmatmul.mubr.bf16.vlgmr.msra.gmra.mrb[32].mxu0 %v482_v25 }
 0x12c   :  { %642 = vmatprep.mubr.bf16.mxu1 %v495_v26  ;;  %602 = vmatprep.mubr.bf16.mxu0 %v485_v27 }
 0x133   :  { %643 = vmatmul.mubr.bf16.gmra.mrb[4].mxu1 %v494_v30  ;;  %603 = vmatmul.mubr.bf16.gmra.mrb[36].mxu0 %v484_v31 }
 0x134   :  { %650 = vmatprep.mubr.bf16.mxu1 %v497_v32  ;;  %610 = vmatprep.mubr.bf16.mxu0 %v487_v34 }
 0x13b   :  { %651 = vmatmul.mubr.bf16.gmra.mrb[8].mxu1 %v496_v37  ;;  %611 = vmatmul.mubr.bf16.gmra.mrb[40].mxu0 %v486_v38 }
 0x13c   :  { %658 = vmatprep.mubr.bf16.mxu1 %v499_v39  ;;  %618 = vmatprep.mubr.bf16.mxu0 %v489_v40 }
 0x143   :  { %659 = vmatmul.mubr.bf16.gmra.mrb[12].mxu1 %v498_v42  ;;  %619 = vmatmul.mubr.bf16.gmra.mrb[44].mxu0 %v488_v43 }
 0x144   :  { %666 = vmatprep.mubr.bf16.mxu1 %v501_v45  ;;  %626 = vmatprep.mubr.bf16.mxu0 %v491_v44 }
 0x14b   :  { %667 = vmatmul.mubr.bf16.gmra.mrb[16].mxu1 %v500_v47  ;;  %627 = vmatmul.mubr.bf16.gmra.mrb[48].mxu0 %v490_v48 }
 0x14c   :  { %674 = vmatprep.mubr.bf16.mxu1 %v503_v49 }
 0x153   :  { %675 = vmatmul.mubr.bf16.gmra.mrb[20].mxu1 %v502_v33 }
 0x154   :  { %682 = vmatprep.mubr.bf16.mxu1 %v505_v51 }
 0x15b   :  { %683 = vmatmul.mubr.bf16.gmra.mrb[24].mxu1 %v504_v53 }
 0x15c   :  { %690 = vmatprep.mubr.bf16.mxu1 %v507_v54 }
 0x163   :  { %691 = vmatmul.mubr.bf16.gmra.mrb[28].mxu1 %v506_v56 }
 0x164   :  { %698 = vmatprep.mubr.bf16.mxu1 %v509_v57 }
 0x16b   :  { %699 = vmatmul.mubr.bf16.gmra.mrb[32].mxu1 %v508_v59 }
 0x16c   :  { %706 = vmatprep.mubr.bf16.mxu1 %v511_v60 }
 0x173   :  { %707 = vmatmul.mubr.bf16.gmra.mrb[36].mxu1 %v510_v62 }
 0x174   :  { %714 = vmatprep.mubr.bf16.mxu1 %v513_v63 }
 0x17b   :  { %715 = vmatmul.mubr.bf16.gmra.mrb[40].mxu1 %v512_v0 }
 0x1fe   :  { %v1868_v1 = vpop.f32.mrb[0].mxu1  ;;  %v1838_v2 = vpop.f32.mrb[32].mxu0 }
 0x1ff   :  { %v1869_v3 = vpop.f32.mrb[1].mxu1  ;;  %v1839_v4 = vpop.f32.mrb[33].mxu0 }
 0x200   :  { %v1870_v5 = vadd.f32 %v1869_v3, %v1868_v1  ;;  %v1871_v6 = vpop.f32.mrb[2].mxu1  ;;  %v1840_v7 = vadd.f32 %v1839_v4, %v1838_v2  ;;  %v1841_v8 = vpop.f32.mrb[34].mxu0 }
 0x201   :  { %v1872_v9 = vpop.f32.mrb[3].mxu1  ;;  %v1842_v10 = vpop.f32.mrb[35].mxu0 }
 0x202   :  { %v1873_v11 = vadd.f32 %v1872_v9, %v1871_v6  ;;  %v1843_v12 = vadd.f32 %v1842_v10, %v1841_v8  ;;  %765 = vst [vmem:[#allocation2 + $0x50] sm:$0xff] %v1870_v5  ;;  %755 = vst [vmem:[#allocation2] sm:$0xff] %v1840_v7 }
 0x204   :  { %766 = vst [vmem:[#allocation2 + $0x58] sm:$0xff] %v1873_v11  ;;  %756 = vst [vmem:[#allocation2 + $0x8] sm:$0xff] %v1843_v12 }
 0x206   :  { %v1874_v13 = vpop.f32.mrb[4].mxu1  ;;  %v1844_v14 = vpop.f32.mrb[36].mxu0 }
 0x207   :  { %v1875_v15 = vpop.f32.mrb[5].mxu1  ;;  %v1845_v16 = vpop.f32.mrb[37].mxu0 }
 0x208   :  { %v1876_v17 = vadd.f32 %v1875_v15, %v1874_v13  ;;  %v1877_v18 = vpop.f32.mrb[6].mxu1  ;;  %v1846_v19 = vadd.f32 %v1845_v16, %v1844_v14  ;;  %v1847_v20 = vpop.f32.mrb[38].mxu0 }
 0x209   :  { %v1878_v21 = vpop.f32.mrb[7].mxu1  ;;  %v1848_v22 = vpop.f32.mrb[39].mxu0 }
 0x20a   :  { %v1879_v23 = vadd.f32 %v1878_v21, %v1877_v18  ;;  %v1849_v24 = vadd.f32 %v1848_v22, %v1847_v20  ;;  %767 = vst [vmem:[#allocation2 + $0x60] sm:$0xff] %v1876_v17  ;;  %757 = vst [vmem:[#allocation2 + $0x10] sm:$0xff] %v1846_v19 }
 0x20c   :  { %768 = vst [vmem:[#allocation2 + $0x68] sm:$0xff] %v1879_v23  ;;  %758 = vst [vmem:[#allocation2 + $0x18] sm:$0xff] %v1849_v24 }
 0x20e   :  { %v1880_v25 = vpop.f32.mrb[8].mxu1  ;;  %v1850_v26 = vpop.f32.mrb[40].mxu0 }
 0x20f   :  { %v1881_v27 = vpop.f32.mrb[9].mxu1  ;;  %v1851_v28 = vpop.f32.mrb[41].mxu0 }
 0x210   :  { %v1882_v29 = vadd.f32 %v1881_v27, %v1880_v25  ;;  %v1883_v30 = vpop.f32.mrb[10].mxu1  ;;  %v1852_v31 = vadd.f32 %v1851_v28, %v1850_v26  ;;  %v1853_v32 = vpop.f32.mrb[42].mxu0 }
 0x211   :  { %v1884_v34 = vpop.f32.mrb[11].mxu1  ;;  %v1854_v35 = vpop.f32.mrb[43].mxu0 }
 0x212   :  { %v1885_v36 = vadd.f32 %v1884_v34, %v1883_v30  ;;  %v1855_v37 = vadd.f32 %v1854_v35, %v1853_v32  ;;  %769 = vst [vmem:[#allocation2 + $0x70] sm:$0xff] %v1882_v29  ;;  %759 = vst [vmem:[#allocation2 + $0x20] sm:$0xff] %v1852_v31  ;;  %v806_v34 = vld [vmem:[%s2228_s20 + $0x80] sm:$0xff] (!%p1617_p6) }
 0x213   :  { %v790_v35 = vld [vmem:[%s2228_s20] sm:$0xff] (!%p1617_p6) }
 0x214   :  { %770 = vst [vmem:[#allocation2 + $0x78] sm:$0xff] %v1885_v36  ;;  %760 = vst [vmem:[#allocation2 + $0x28] sm:$0xff] %v1855_v37  ;;  %v2145_v36 = vmov (!%p1617_p6), 0   ;;  %v807_v37 = vld [vmem:[%s2228_s20 + $0x88] sm:$0xff] (!%p1617_p6) }
 0x215   :  { %2095 = vset.pattern.permute.xlu1 (!%p1617_p6), %v2145_v36  ;;  %2094 = vset.pattern.permute.xlu0 (!%p1617_p6), %v2145_v36 }
 0x216   :  { %v1886_v38 = vpop.f32.mrb[12].mxu1  ;;  %v1856_v39 = vpop.f32.mrb[44].mxu0  ;;  %936 = vperm.xlu1 (!%p1617_p6), %2095, %v806_v34   ;;  %856 = vperm.xlu0 (!%p1617_p6), %2094, %v790_v35  }
 0x217   :  { %v1887_v40 = vpop.f32.mrb[13].mxu1  ;;  %v1857_v41 = vpop.f32.mrb[45].mxu0 }
 0x218   :  { %v1888_v42 = vadd.f32 %v1887_v40, %v1886_v38  ;;  %v1889_v43 = vpop.f32.mrb[14].mxu1  ;;  %v1858_v44 = vadd.f32 %v1857_v41, %v1856_v39  ;;  %v1859_v45 = vpop.f32.mrb[46].mxu0  ;;  %v791_v38 = vld [vmem:[%s2228_s20 + $0x8] sm:$0xff] (!%p1617_p6)  ;;  %v793_v39 = vld [vmem:[%s2228_s20 + $0x18] sm:$0xff] (!%p1617_p6)  ;;  %v792_v40 = vld [vmem:[%s2228_s20 + $0x10] sm:$0xff] (!%p1617_p6) }
 0x219   :  { %v1890_v46 = vpop.f32.mrb[15].mxu1  ;;  %v1860_v47 = vpop.f32.mrb[47].mxu0  ;;  %v809_v41 = vld [vmem:[%s2228_s20 + $0x98] sm:$0xff] (!%p1617_p6) }
 0x21a   :  { %v1891_v48 = vadd.f32 %v1890_v46, %v1889_v43  ;;  %v1861_v49 = vadd.f32 %v1860_v47, %v1859_v45  ;;  %771 = vst [vmem:[#allocation2 + $0x80] sm:$0xff] %v1888_v42  ;;  %761 = vst [vmem:[#allocation2 + $0x30] sm:$0xff] %v1858_v44  ;;  %941 = vperm.xlu1 (!%p1617_p6), %2095, %v807_v37   ;;  %861 = vperm.xlu0 (!%p1617_p6), %2094, %v791_v38   ;;  %v808_v42 = vld [vmem:[%s2228_s20 + $0x90] sm:$0xff] (!%p1617_p6)  ;;  %v2096_v43 = vld [vmem:[%s2577_s7] sm:$0xff] (!%p1617_p6)  }
 0x21b   :  { %v2097_v44 = vld [vmem:[%s2577_s7 + $0x8] sm:$0xff] (!%p1617_p6)   ;;  %2008 = vmatprep.subr.bf16.mxu0 (!%p1617_p6), %v2096_v43  ;;  %2072 = vmatprep.subr.bf16.mxu1 (!%p1617_p6), %v2096_v43  ;;  %v794_v46 = vld [vmem:[%s2228_s20 + $0x20] sm:$0xff] (!%p1617_p6)  ;;  %v2098_v47 = vld [vmem:[%s2577_s7 + $0x10] sm:$0xff] (!%p1617_p6)  }
 0x21c   :  { %772 = vst [vmem:[#allocation2 + $0x88] sm:$0xff] %v1891_v48  ;;  %762 = vst [vmem:[#allocation2 + $0x38] sm:$0xff] %v1861_v49  ;;  %v795_v45 = vld [vmem:[%s2228_s20 + $0x28] sm:$0xff] (!%p1617_p6)  ;;  %2009 = vmatpush3.bf16.msra.mxu0 (!%p1617_p6), %v2096_v43  ;;  %2080 = vmatpush3.bf16.msra.mxu1 (!%p1617_p6), %v2096_v43  ;;  %v810_v49 = vld [vmem:[%s2228_s20 + $0xa0] sm:$0xff] (!%p1617_p6) }
 0x21d   :  { %2010 = vmatprep.subr.bf16.mxu0 (!%p1617_p6), %v2097_v44  ;;  %2073 = vmatprep.subr.bf16.mxu1 (!%p1617_p6), %v2097_v44  ;;  %v811_v48 = vld [vmem:[%s2228_s20 + $0xa8] sm:$0xff] (!%p1617_p6) }
 0x21e   :  { %v1892_v50 = vpop.f32.mrb[16].mxu1  ;;  %v1862_v33 = vpop.f32.mrb[48].mxu0  ;;  %871 = vperm.xlu1 (!%p1617_p6), %2095, %v793_v39   ;;  %866 = vperm.xlu0 (!%p1617_p6), %2094, %v792_v40  }
 0x21f   :  { %v1893_v51 = vpop.f32.mrb[17].mxu1  ;;  %v1863_v52 = vpop.f32.mrb[49].mxu0 }
 0x220   :  { %v1894_v53 = vadd.f32 %v1893_v51, %v1892_v50  ;;  %v1895_v54 = vpop.f32.mrb[18].mxu1  ;;  %v1864_v55 = vadd.f32 %v1863_v52, %v1862_v33  ;;  %v1865_v56 = vpop.f32.mrb[50].mxu0  ;;  %2011 = vmatpush3.bf16.msra.mxu0 (!%p1617_p6), %v2097_v44  ;;  %2081 = vmatpush3.bf16.msra.mxu1 (!%p1617_p6), %v2097_v44  ;;  %v2099_v50 = vld [vmem:[%s2577_s7 + $0x18] sm:$0xff] (!%p1617_p6)   ;;  %v796_v51 = vld [vmem:[%s2228_s20 + $0x30] sm:$0xff] (!%p1617_p6)  ;;  %v2100_v52 = vld [vmem:[%s2577_s7 + $0x20] sm:$0xff] (!%p1617_p6)  }
 0x221   :  { %v1896_v57 = vpop.f32.mrb[19].mxu1  ;;  %v1866_v58 = vpop.f32.mrb[51].mxu0  ;;  %2012 = vmatprep.subr.bf16.mxu0 (!%p1617_p6), %v2098_v47  ;;  %2074 = vmatprep.subr.bf16.mxu1 (!%p1617_p6), %v2098_v47  ;;  %v797_v33 = vld [vmem:[%s2228_s20 + $0x38] sm:$0xff] (!%p1617_p6) }
 0x222   :  { %v1897_v59 = vadd.f32 %v1896_v57, %v1895_v54  ;;  %v1867_v60 = vadd.f32 %v1866_v58, %v1865_v56  ;;  %773 = vst [vmem:[#allocation2 + $0x90] sm:$0xff] %v1894_v53  ;;  %763 = vst [vmem:[#allocation2 + $0x40] sm:$0xff] %v1864_v55  ;;  %951 = vperm.xlu1 (!%p1617_p6), %2095, %v809_v41   ;;  %946 = vperm.xlu0 (!%p1617_p6), %2094, %v808_v42   ;;  %v813_v53 = vld [vmem:[%s2228_s20 + $0xb8] sm:$0xff] (!%p1617_p6)  ;;  %v812_v54 = vld [vmem:[%s2228_s20 + $0xb0] sm:$0xff] (!%p1617_p6) }
 0x223   :  { %v2101_v55 = vld [vmem:[%s2577_s7 + $0x28] sm:$0xff] (!%p1617_p6)   ;;  %v798_v57 = vld [vmem:[%s2228_s20 + $0x40] sm:$0xff] (!%p1617_p6)  ;;  %v2102_v58 = vld [vmem:[%s2577_s7 + $0x30] sm:$0xff] (!%p1617_p6)  }
 0x224   :  { %774 = vst [vmem:[#allocation2 + $0x98] sm:$0xff] %v1897_v59  ;;  %764 = vst [vmem:[#allocation2 + $0x48] sm:$0xff] %v1867_v60  ;;  %2013 = vmatpush3.bf16.msra.mxu0 (!%p1617_p6), %v2098_v47  ;;  %2082 = vmatpush3.bf16.msra.mxu1 (!%p1617_p6), %v2098_v47  ;;  %v799_v56 = vld [vmem:[%s2228_s20 + $0x48] sm:$0xff] (!%p1617_p6)  ;;  %v814_v60 = vld [vmem:[%s2228_s20 + $0xc0] sm:$0xff] (!%p1617_p6) }
 0x225   :  { %2014 = vmatprep.subr.bf16.mxu0 (!%p1617_p6), %v2099_v50  ;;  %2075 = vmatprep.subr.bf16.mxu1 (!%p1617_p6), %v2099_v50  ;;  %v815_v59 = vld [vmem:[%s2228_s20 + $0xc8] sm:$0xff] (!%p1617_p6) }
 0x226   :  { %v1898_v61 = vpop.f32.mrb[20].mxu1  ;;  %881 = vperm.xlu1 (!%p1617_p6), %2095, %v795_v45   ;;  %876 = vperm.xlu0 (!%p1617_p6), %2094, %v794_v46  }
 0x227   :  { %v1899_v62 = vpop.f32.mrb[21].mxu1 }
 0x228   :  { %v1900_v63 = vadd.f32 %v1899_v62, %v1898_v61  ;;  %v1901_v0 = vpop.f32.mrb[22].mxu1  ;;  %2015 = vmatpush3.bf16.msra.mxu0 (!%p1617_p6), %v2099_v50  ;;  %2083 = vmatpush3.bf16.msra.mxu1 (!%p1617_p6), %v2099_v50  ;;  %v2103_v61 = vld [vmem:[%s2577_s7 + $0x38] sm:$0xff] (!%p1617_p6)   ;;  %v827_v50 = vld [vmem:[#allocation2 + $0x28] sm:$0xff] (!%p1617_p6) }
 0x229   :  { %v1902_v1 = vpop.f32.mrb[23].mxu1  ;;  %2016 = vmatprep.subr.bf16.mxu0 (!%p1617_p6), %v2100_v52  ;;  %2076 = vmatprep.subr.bf16.mxu1 (!%p1617_p6), %v2100_v52  ;;  %v801_v62 = vld [vmem:[%s2228_s20 + $0x58] sm:$0xff] (!%p1617_p6)  ;;  %v840_v39 = vld [vmem:[#allocation2 + $0x90] sm:$0xff] (!%p1617_p6) }
 0x22a   :  { %v1903_v2 = vadd.f32 %v1902_v1, %v1901_v0  ;;  %775 = vst [vmem:[#allocation2 + $0xa0] sm:$0xff] %v1900_v63  ;;  %961 = vperm.xlu1 (!%p1617_p6), %2095, %v811_v48   ;;  %956 = vperm.xlu0 (!%p1617_p6), %2094, %v810_v49   ;;  %v800_v63 = vld [vmem:[%s2228_s20 + $0x50] sm:$0xff] (!%p1617_p6)  ;;  %v817_v0 = vld [vmem:[%s2228_s20 + $0xd8] sm:$0xff] (!%p1617_p6) }
 0x22b   :  { %v816_v1 = vld [vmem:[%s2228_s20 + $0xd0] sm:$0xff] (!%p1617_p6)  ;;  %v841_v38 = vld [vmem:[#allocation2 + $0x98] sm:$0xff] (!%p1617_p6) }
 0x22c   :  { %776 = vst [vmem:[#allocation2 + $0xa8] sm:$0xff] %v1903_v2  ;;  %2017 = vmatpush3.bf16.msra.mxu0 (!%p1617_p6), %v2100_v52  ;;  %2084 = vmatpush3.bf16.msra.mxu1 (!%p1617_p6), %v2100_v52  ;;  %v803_v2 = vld [vmem:[%s2228_s20 + $0x68] sm:$0xff] (!%p1617_p6) }
 0x22d   :  { %2018 = vmatprep.subr.bf16.mxu0 (!%p1617_p6), %v2101_v55  ;;  %2077 = vmatprep.subr.bf16.mxu1 (!%p1617_p6), %v2101_v55 }
 0x22e   :  { %v1904_v3 = vpop.f32.mrb[24].mxu1  ;;  %891 = vperm.xlu1 (!%p1617_p6), %2095, %v797_v33   ;;  %886 = vperm.xlu0 (!%p1617_p6), %2094, %v796_v51   ;;  %v826_v33 = vld [vmem:[#allocation2 + $0x20] sm:$0xff] (!%p1617_p6) }
 0x22f   :  { %v1905_v4 = vpop.f32.mrb[25].mxu1 }
 0x230   :  { %v1906_v5 = vadd.f32 %v1905_v4, %v1904_v3  ;;  %v1907_v6 = vpop.f32.mrb[26].mxu1  ;;  %2019 = vmatpush3.bf16.msra.mxu0 (!%p1617_p6), %v2101_v55  ;;  %2085 = vmatpush3.bf16.msra.mxu1 (!%p1617_p6), %v2101_v55  ;;  %v802_v3 = vld [vmem:[%s2228_s20 + $0x60] sm:$0xff] (!%p1617_p6)  ;;  %v819_v4 = vld [vmem:[%s2228_s20 + $0xe8] sm:$0xff] (!%p1617_p6) }
 0x231   :  { %v1908_v7 = vpop.f32.mrb[27].mxu1  ;;  %2020 = vmatprep.subr.bf16.mxu0 (!%p1617_p6), %v2102_v58  ;;  %2078 = vmatprep.subr.bf16.mxu1 (!%p1617_p6), %v2102_v58 }
 0x232   :  { %v1909_v8 = vadd.f32 %v1908_v7, %v1907_v6  ;;  %777 = vst [vmem:[#allocation2 + $0xb0] sm:$0xff] %v1906_v5  ;;  %971 = vperm.xlu1 (!%p1617_p6), %2095, %v813_v53   ;;  %966 = vperm.xlu0 (!%p1617_p6), %2094, %v812_v54   ;;  %v818_v5 = vld [vmem:[%s2228_s20 + $0xe0] sm:$0xff] (!%p1617_p6)  ;;  %v805_v6 = vld [vmem:[%s2228_s20 + $0x78] sm:$0xff] (!%p1617_p6)  ;;  %v804_v7 = vld [vmem:[%s2228_s20 + $0x70] sm:$0xff] (!%p1617_p6) }
 0x234   :  { %778 = vst [vmem:[#allocation2 + $0xb8] sm:$0xff] %v1909_v8  ;;  %2021 = vmatpush3.bf16.msra.mxu0 (!%p1617_p6), %v2102_v58  ;;  %2086 = vmatpush3.bf16.msra.mxu1 (!%p1617_p6), %v2102_v58  ;;  %v821_v8 = vld [vmem:[%s2228_s20 + $0xf8] sm:$0xff] (!%p1617_p6) }
 0x235   :  { %2022 = vmatprep.subr.bf16.mxu0 (!%p1617_p6), %v2103_v61  ;;  %2079 = vmatprep.subr.bf16.mxu1 (!%p1617_p6), %v2103_v61 }
 0x236   :  { %v1910_v9 = vpop.f32.mrb[28].mxu1  ;;  %901 = vperm.xlu1 (!%p1617_p6), %2095, %v799_v56   ;;  %896 = vperm.xlu0 (!%p1617_p6), %2094, %v798_v57  }
 0x237   :  { %v1911_v10 = vpop.f32.mrb[29].mxu1 }
 0x238   :  { %v1912_v11 = vadd.f32 %v1911_v10, %v1910_v9  ;;  %v1913_v12 = vpop.f32.mrb[30].mxu1  ;;  %2023 = vmatpush3.bf16.msra.mxu0 (!%p1617_p6), %v2103_v61  ;;  %2087 = vmatpush3.bf16.msra.mxu1 (!%p1617_p6), %v2103_v61  ;;  %v820_v9 = vld [vmem:[%s2228_s20 + $0xf0] sm:$0xff] (!%p1617_p6)  ;;  %v838_v10 = vld [vmem:[#allocation2 + $0x80] sm:$0xff] (!%p1617_p6) }
 0x239   :  { %v1914_v13 = vpop.f32.mrb[31].mxu1  ;;  %v842_v61 = vld [vmem:[#allocation2 + $0xa0] sm:$0xff] (!%p1617_p6) }
 0x23a   :  { %v1915_v14 = vadd.f32 %v1914_v13, %v1913_v12  ;;  %779 = vst [vmem:[#allocation2 + $0xc0] sm:$0xff] %v1912_v11  ;;  %981 = vperm.xlu1 (!%p1617_p6), %2095, %v815_v59   ;;  %976 = vperm.xlu0 (!%p1617_p6), %2094, %v814_v60   ;;  %v822_v11 = vld [vmem:[#allocation2] sm:$0xff] (!%p1617_p6)  ;;  %v843_v60 = vld [vmem:[#allocation2 + $0xa8] sm:$0xff] (!%p1617_p6) }
 0x23c   :  { %780 = vst [vmem:[#allocation2 + $0xc8] sm:$0xff] %v1915_v14 }
 0x23e   :  { %v1916_v15 = vpop.f32.mrb[32].mxu1  ;;  %911 = vperm.xlu1 (!%p1617_p6), %2095, %v801_v62   ;;  %906 = vperm.xlu0 (!%p1617_p6), %2094, %v800_v63  }
 0x23f   :  { %v1917_v16 = vpop.f32.mrb[33].mxu1 }
 0x240   :  { %v1918_v17 = vadd.f32 %v1917_v16, %v1916_v15  ;;  %v1919_v18 = vpop.f32.mrb[34].mxu1  ;;  %v2405_v16 = vld [vmem:[%s2576_s6] ss:$0 sm:$0xff] (!%p1617_p6) }
 0x241   :  { %v1920_v19 = vpop.f32.mrb[35].mxu1 }
 0x242   :  { %v1921_v20 = vadd.f32 %v1920_v19, %v1919_v18  ;;  %781 = vst [vmem:[#allocation2 + $0xd0] sm:$0xff] %v1918_v17  ;;  %991 = vperm.xlu1 (!%p1617_p6), %2095, %v817_v0   ;;  %986 = vperm.xlu0 (!%p1617_p6), %2094, %v816_v1   ;;  %v839_v17 = vld [vmem:[#allocation2 + $0x88] sm:$0xff] (!%p1617_p6) }
 0x243   :  { %v823_v18 = vld [vmem:[#allocation2 + $0x8] sm:$0xff] (!%p1617_p6) }
 0x244   :  { %782 = vst [vmem:[#allocation2 + $0xd8] sm:$0xff] %v1921_v20 }
 0x246   :  { %v1922_v21 = vpop.f32.mrb[36].mxu1  ;;  %921 = vperm.xlu1 (!%p1617_p6), %2095, %v803_v2   ;;  %916 = vperm.xlu0 (!%p1617_p6), %2094, %v802_v3  }
 0x247   :  { %v1923_v22 = vpop.f32.mrb[37].mxu1 }
 0x248   :  { %v1924_v23 = vadd.f32 %v1923_v22, %v1922_v21  ;;  %v1925_v24 = vpop.f32.mrb[38].mxu1 }
 0x249   :  { %v1926_v25 = vpop.f32.mrb[39].mxu1 }
 0x24a   :  { %v1927_v26 = vadd.f32 %v1926_v25, %v1925_v24  ;;  %783 = vst [vmem:[#allocation2 + $0xe0] sm:$0xff] %v1924_v23  ;;  %1001 = vperm.xlu1 (!%p1617_p6), %2095, %v819_v4   ;;  %996 = vperm.xlu0 (!%p1617_p6), %2094, %v818_v5   ;;  %v825_v25 = vld [vmem:[#allocation2 + $0x18] sm:$0xff] (!%p1617_p6) }
 0x24c   :  { %784 = vst [vmem:[#allocation2 + $0xe8] sm:$0xff] %v1927_v26  ;;  %v824_v26 = vld [vmem:[#allocation2 + $0x10] sm:$0xff] (!%p1617_p6) }
 0x24e   :  { %v1928_v27 = vpop.f32.mrb[40].mxu1  ;;  %789 = sbr.rel (%p1617_p6) target bundleno = 950 (0x3b6), region = 33  ;;  %931 = vperm.xlu1 (!%p1617_p6), %2095, %v805_v6   ;;  %926 = vperm.xlu0 (!%p1617_p6), %2094, %v804_v7   ;;  %v829_v7 = vld [vmem:[#allocation2 + $0x38] sm:$0xff] (!%p1617_p6) }
 0x24f   :  { %v1929_v28 = vpop.f32.mrb[41].mxu1 }
 0x250   :  { %v1930_v29 = vadd.f32 %v1929_v28, %v1928_v27  ;;  %v1931_v30 = vpop.f32.mrb[42].mxu1 }
 0x251   :  { %v1932_v31 = vpop.f32.mrb[43].mxu1 }
 0x252   :  { %v1933_v32 = vadd.f32 %v1932_v31, %v1931_v30  ;;  %785 = vst [vmem:[#allocation2 + $0xf0] sm:$0xff] %v1930_v29  ;;  %1011 = vperm.xlu1 (!%p1617_p6), %2095, %v821_v8   ;;  %1006 = vperm.xlu0 (!%p1617_p6), %2094, %v820_v9   ;;  %v828_v8 = vld [vmem:[#allocation2 + $0x30] sm:$0xff] (!%p1617_p6) }
 0x254   :  { %786 = vst [vmem:[#allocation2 + $0xf8] sm:$0xff] %v1933_v32 }
 0x295   :  { %v2396_v12 = vpop.permute.xlu1 %936  ;;  %v2398_v13 = vpop.permute.xlu0 %856 }
 0x296   :  { %v1030_v14 = vmul.f32 %v2396_v12, %v838_v10  ;;  %v1014_v15 = vmul.f32 %v2398_v13, %v822_v11 }
 0x298   :  { %v1053_v21 = vadd.f32 %v2405_v16, %v1014_v15  ;;  %v1069_v22 = vadd.f32 %v2405_v16, %v1030_v14 }
 0x299   :  { %v2407_v19 = vpop.permute.xlu1 %941  ;;  %v2409_v20 = vpop.permute.xlu0 %861 }
 0x29a   :  { %v1031_v23 = vmul.f32 %v2407_v19, %v839_v17  ;;  %v1015_v24 = vmul.f32 %v2409_v20, %v823_v18  ;;  %v1085_v31 = vmax.f32 %v1053_v21, 0.0  ;;  %v1101_v32 = vmax.f32 %v1069_v22, 0.0 }
 0x29c   :  { %v1054_v27 = vadd.f32 %v2405_v16, %v1015_v24  ;;  %v1070_v28 = vadd.f32 %v2405_v16, %v1031_v23  ;;  %v845_v23 = vld [vmem:[#allocation2 + $0xb8] sm:$0xff]  ;;  %v844_v24 = vld [vmem:[#allocation2 + $0xb0] sm:$0xff] }
 0x29d   :  { %v2417_v29 = vpop.permute.xlu1 %871  ;;  %v2419_v30 = vpop.permute.xlu0 %866 }
 0x29e   :  { %v1017_v34 = vmul.f32 %v2417_v29, %v825_v25  ;;  %v1016_v35 = vmul.f32 %v2419_v30, %v824_v26  ;;  %v1086_v36 = vmax.f32 %v1054_v27, 0.0  ;;  %v1102_v37 = vmax.f32 %v1070_v28, 0.0 }
 0x2a0   :  { %v1056_v40 = vadd.f32 %v2405_v16, %v1017_v34  ;;  %v1055_v41 = vadd.f32 %v2405_v16, %v1016_v35  ;;  %v1117_v42 = vpack.c.bf16 %v1086_v36, %v1085_v31  ;;  %v1125_v43 = vpack.c.bf16 %v1102_v37, %v1101_v32  ;;  %v831_v37 = vld [vmem:[#allocation2 + $0x48] sm:$0xff] }
 0x2a1   :  { %v2425_v44 = vpop.permute.xlu1 %951  ;;  %v2427_v45 = vpop.permute.xlu0 %946 }
 0x2a2   :  { %v1088_v46 = vmax.f32 %v1056_v40, 0.0  ;;  %v1087_v47 = vmax.f32 %v1055_v41, 0.0  ;;  %v1033_v48 = vmul.f32 %v2425_v44, %v841_v38  ;;  %v1032_v49 = vmul.f32 %v2427_v45, %v840_v39  ;;  %2024 = vmatprep.mubr.bf16.mxu0 %v1117_v42  ;;  %2040 = vmatprep.mubr.bf16.mxu1 %v1125_v43  ;;  %v830_v38 = vld [vmem:[#allocation2 + $0x40] sm:$0xff] }
 0x2a4   :  { %v1072_v51 = vadd.f32 %v2405_v16, %v1033_v48  ;;  %v1071_v52 = vadd.f32 %v2405_v16, %v1032_v49  ;;  %v1118_v53 = vpack.c.bf16 %v1088_v46, %v1087_v47 }
 0x2a5   :  { %v2433_v54 = vpop.permute.xlu1 %881  ;;  %v2435_v55 = vpop.permute.xlu0 %876 }
 0x2a6   :  { %v1104_v56 = vmax.f32 %v1072_v51, 0.0  ;;  %v1103_v57 = vmax.f32 %v1071_v52, 0.0  ;;  %v1019_v58 = vmul.f32 %v2433_v54, %v827_v50  ;;  %v1018_v59 = vmul.f32 %v2435_v55, %v826_v33  ;;  %2025 = vmatmul.mubr.bf16.vlgmr.msra.gmra.mrb[0].mxu0 %v1118_v53  ;;  %v847_v50 = vld [vmem:[#allocation2 + $0xc8] sm:$0xff]  ;;  %v846_v33 = vld [vmem:[#allocation2 + $0xc0] sm:$0xff] }
 0x2a8   :  { %v1058_v62 = vadd.f32 %v2405_v16, %v1019_v58  ;;  %v1057_v63 = vadd.f32 %v2405_v16, %v1018_v59  ;;  %v1126_v0 = vpack.c.bf16 %v1104_v56, %v1103_v57 }
 0x2a9   :  { %v2441_v1 = vpop.permute.xlu1 %961  ;;  %v2443_v2 = vpop.permute.xlu0 %956 }
 0x2aa   :  { %v1090_v3 = vmax.f32 %v1058_v62, 0.0  ;;  %v1089_v4 = vmax.f32 %v1057_v63, 0.0  ;;  %v1035_v5 = vmul.f32 %v2441_v1, %v843_v60  ;;  %v1034_v6 = vmul.f32 %v2443_v2, %v842_v61  ;;  %2041 = vmatmul.mubr.bf16.vlgmr.msra.gmra.mrb[0].mxu1 %v1126_v0  ;;  %v833_v62 = vld [vmem:[#allocation2 + $0x58] sm:$0xff]  ;;  %v832_v63 = vld [vmem:[#allocation2 + $0x50] sm:$0xff] }
 0x2ac   :  { %v1074_v9 = vadd.f32 %v2405_v16, %v1035_v5  ;;  %v1073_v10 = vadd.f32 %v2405_v16, %v1034_v6  ;;  %v1119_v11 = vpack.c.bf16 %v1090_v3, %v1089_v4 }
 0x2ad   :  { %v2449_v14 = vpop.permute.xlu1 %891  ;;  %v2451_v15 = vpop.permute.xlu0 %886 }
 0x2ae   :  { %v1106_v17 = vmax.f32 %v1074_v9, 0.0  ;;  %v1105_v18 = vmax.f32 %v1073_v10, 0.0  ;;  %v1021_v21 = vmul.f32 %v2449_v14, %v829_v7  ;;  %v1020_v22 = vmul.f32 %v2451_v15, %v828_v8  ;;  %2028 = vmatprep.mubr.bf16.mxu0 %v1119_v11  ;;  %v849_v11 = vld [vmem:[#allocation2 + $0xd8] sm:$0xff] }
 0x2b0   :  { %v1060_v25 = vadd.f32 %v2405_v16, %v1021_v21  ;;  %v1059_v26 = vadd.f32 %v2405_v16, %v1020_v22  ;;  %v1127_v27 = vpack.c.bf16 %v1106_v17, %v1105_v18  ;;  %v848_v17 = vld [vmem:[#allocation2 + $0xd0] sm:$0xff] }
 0x2b1   :  { %v2457_v28 = vpop.permute.xlu1 %971  ;;  %v2459_v31 = vpop.permute.xlu0 %966 }
 0x2b2   :  { %v1092_v32 = vmax.f32 %v1060_v25, 0.0  ;;  %v1091_v34 = vmax.f32 %v1059_v26, 0.0  ;;  %v1037_v35 = vmul.f32 %v2457_v28, %v845_v23  ;;  %v1036_v36 = vmul.f32 %v2459_v31, %v844_v24  ;;  %2044 = vmatprep.mubr.bf16.mxu1 %v1127_v27 }
 0x2b4   :  { %v1076_v39 = vadd.f32 %v2405_v16, %v1037_v35  ;;  %v1075_v40 = vadd.f32 %v2405_v16, %v1036_v36  ;;  %v1120_v41 = vpack.c.bf16 %v1092_v32, %v1091_v34  ;;  %v835_v34 = vld [vmem:[#allocation2 + $0x68] sm:$0xff]  ;;  %v834_v35 = vld [vmem:[#allocation2 + $0x60] sm:$0xff] }
 0x2b5   :  { %v2465_v42 = vpop.permute.xlu1 %901  ;;  %v2467_v43 = vpop.permute.xlu0 %896 }
 0x2b6   :  { %v1108_v46 = vmax.f32 %v1076_v39, 0.0  ;;  %v1107_v47 = vmax.f32 %v1075_v40, 0.0  ;;  %v1023_v48 = vmul.f32 %v2465_v42, %v831_v37  ;;  %v1022_v49 = vmul.f32 %v2467_v43, %v830_v38  ;;  %2029 = vmatmul.mubr.bf16.gmra.mrb[4].mxu0 %v1120_v41 }
 0x2b8   :  { %v1062_v51 = vadd.f32 %v2405_v16, %v1023_v48  ;;  %v1061_v52 = vadd.f32 %v2405_v16, %v1022_v49  ;;  %v1128_v53 = vpack.c.bf16 %v1108_v46, %v1107_v47  ;;  %v851_v49 = vld [vmem:[#allocation2 + $0xe8] sm:$0xff] }
 0x2b9   :  { %v2473_v56 = vpop.permute.xlu1 %981  ;;  %v2475_v57 = vpop.permute.xlu0 %976 }
 0x2ba   :  { %v1094_v58 = vmax.f32 %v1062_v51, 0.0  ;;  %v1093_v59 = vmax.f32 %v1061_v52, 0.0  ;;  %v1039_v60 = vmul.f32 %v2473_v56, %v847_v50  ;;  %v1038_v61 = vmul.f32 %v2475_v57, %v846_v33  ;;  %2045 = vmatmul.mubr.bf16.gmra.mrb[4].mxu1 %v1128_v53  ;;  %v850_v50 = vld [vmem:[#allocation2 + $0xe0] sm:$0xff] }
 0x2bc   :  { %v1078_v0 = vadd.f32 %v2405_v16, %v1039_v60  ;;  %v1077_v3 = vadd.f32 %v2405_v16, %v1038_v61  ;;  %v1121_v4 = vpack.c.bf16 %v1094_v58, %v1093_v59 }
 0x2bd   :  { %v2481_v5 = vpop.permute.xlu1 %911  ;;  %v2483_v6 = vpop.permute.xlu0 %906 }
 0x2be   :  { %v1110_v7 = vmax.f32 %v1078_v0, 0.0  ;;  %v1109_v8 = vmax.f32 %v1077_v3, 0.0  ;;  %v1025_v9 = vmul.f32 %v2481_v5, %v833_v62  ;;  %v1024_v10 = vmul.f32 %v2483_v6, %v832_v63  ;;  %2032 = vmatprep.mubr.bf16.mxu0 %v1121_v4  ;;  %v837_v63 = vld [vmem:[#allocation2 + $0x78] sm:$0xff]  ;;  %v836_v0 = vld [vmem:[#allocation2 + $0x70] sm:$0xff] }
 0x2c0   :  { %v1064_v18 = vadd.f32 %v2405_v16, %v1025_v9  ;;  %v1063_v21 = vadd.f32 %v2405_v16, %v1024_v10  ;;  %v1129_v22 = vpack.c.bf16 %v1110_v7, %v1109_v8 }
 0x2c1   :  { %v2489_v23 = vpop.permute.xlu1 %991  ;;  %v2491_v24 = vpop.permute.xlu0 %986 }
 0x2c2   :  { %v1096_v25 = vmax.f32 %v1064_v18, 0.0  ;;  %v1095_v26 = vmax.f32 %v1063_v21, 0.0  ;;  %v1041_v27 = vmul.f32 %v2489_v23, %v849_v11  ;;  %v1040_v32 = vmul.f32 %v2491_v24, %v848_v17  ;;  %2048 = vmatprep.mubr.bf16.mxu1 %v1129_v22  ;;  %v853_v21 = vld [vmem:[#allocation2 + $0xf8] sm:$0xff]  ;;  %v852_v22 = vld [vmem:[#allocation2 + $0xf0] sm:$0xff] }
 0x2c4   :  { %v1080_v36 = vadd.f32 %v2405_v16, %v1041_v27  ;;  %v1079_v37 = vadd.f32 %v2405_v16, %v1040_v32  ;;  %v1122_v38 = vpack.c.bf16 %v1096_v25, %v1095_v26 }
 0x2c5   :  { %v2497_v39 = vpop.permute.xlu1 %921  ;;  %v2499_v40 = vpop.permute.xlu0 %916 }
 0x2c6   :  { %v1112_v41 = vmax.f32 %v1080_v36, 0.0  ;;  %v1111_v46 = vmax.f32 %v1079_v37, 0.0  ;;  %v1027_v47 = vmul.f32 %v2497_v39, %v835_v34  ;;  %v1026_v48 = vmul.f32 %v2499_v40, %v834_v35  ;;  %2033 = vmatmul.mubr.bf16.gmra.mrb[8].mxu0 %v1122_v38 }
 0x2c8   :  { %v1066_v33 = vadd.f32 %v2405_v16, %v1027_v47  ;;  %v1065_v51 = vadd.f32 %v2405_v16, %v1026_v48  ;;  %v1130_v52 = vpack.c.bf16 %v1112_v41, %v1111_v46 }
 0x2c9   :  { %v2505_v53 = vpop.permute.xlu1 %1001  ;;  %v2507_v58 = vpop.permute.xlu0 %996 }
 0x2ca   :  { %v1098_v59 = vmax.f32 %v1066_v33, 0.0  ;;  %v1097_v60 = vmax.f32 %v1065_v51, 0.0  ;;  %v1043_v61 = vmul.f32 %v2505_v53, %v851_v49  ;;  %v1042_v62 = vmul.f32 %v2507_v58, %v850_v50  ;;  %2049 = vmatmul.mubr.bf16.gmra.mrb[8].mxu1 %v1130_v52 }
 0x2cc   :  { %v1082_v3 = vadd.f32 %v2405_v16, %v1043_v61  ;;  %v1081_v4 = vadd.f32 %v2405_v16, %v1042_v62  ;;  %v1123_v7 = vpack.c.bf16 %v1098_v59, %v1097_v60 }
 0x2cd   :  { %v2513_v8 = vpop.permute.xlu1 %931  ;;  %v2515_v9 = vpop.permute.xlu0 %926 }
 0x2ce   :  { %v1114_v10 = vmax.f32 %v1082_v3, 0.0  ;;  %v1113_v11 = vmax.f32 %v1081_v4, 0.0  ;;  %v1029_v17 = vmul.f32 %v2513_v8, %v837_v63  ;;  %v1028_v18 = vmul.f32 %v2515_v9, %v836_v0  ;;  %2036 = vmatprep.mubr.bf16.mxu0 %v1123_v7 }
 0x2d0   :  { %v1068_v25 = vadd.f32 %v2405_v16, %v1029_v17  ;;  %v1067_v26 = vadd.f32 %v2405_v16, %v1028_v18  ;;  %v1131_v27 = vpack.c.bf16 %v1114_v10, %v1113_v11 }
 0x2d1   :  { %v2521_v32 = vpop.permute.xlu1 %1011  ;;  %v2523_v34 = vpop.permute.xlu0 %1006 }
 0x2d2   :  { %v1100_v35 = vmax.f32 %v1068_v25, 0.0  ;;  %v1099_v36 = vmax.f32 %v1067_v26, 0.0  ;;  %v1045_v37 = vmul.f32 %v2521_v32, %v853_v21  ;;  %v1044_v38 = vmul.f32 %v2523_v34, %v852_v22  ;;  %2052 = vmatprep.mubr.bf16.mxu1 %v1131_v27 }
 0x2d4   :  { %v1084_v41 = vadd.f32 %v2405_v16, %v1045_v37  ;;  %v1083_v46 = vadd.f32 %v2405_v16, %v1044_v38  ;;  %v1124_v47 = vpack.c.bf16 %v1100_v35, %v1099_v36 }
 0x2d6   :  { %v1116_v48 = vmax.f32 %v1084_v41, 0.0  ;;  %v1115_v49 = vmax.f32 %v1083_v46, 0.0  ;;  %2037 = vmatmul.mubr.bf16.gmra.mrb[12].mxu0 %v1124_v47 }
 0x2d8   :  { %v1132_v50 = vpack.c.bf16 %v1116_v48, %v1115_v49 }
 0x2da   :  { %2053 = vmatmul.mubr.bf16.gmra.mrb[12].mxu1 %v1132_v50 }
 0x379   :  { %v2026_v33 = vpop.f32.mrb[0].mxu0 }
 0x37a   :  { %v1231_v51 = vpop.f32.mrb[1].mxu0  ;;  %v1360_v59 = vmul.f32 %v2026_v33, %v2419_v30 }
 0x37b   :  { %v2027_v52 = vpop.f32.mrb[2].mxu0  ;;  %v1358_v62 = vmul.f32 %v1231_v51, %v2398_v13 }
 0x37c   :  { %v1361_v60 = vmul.f32 %v2027_v52, %v2417_v29  ;;  %v1234_v61 = vpop.f32.mrb[3].mxu0 }
 0x37d   :  { %v1359_v63 = vmul.f32 %v1234_v61, %v2409_v20  ;;  %v2042_v0 = vpop.f32.mrb[0].mxu1 }
 0x37e   :  { %v1702_v16 = vpack.c.bf16 %v1361_v60, %v1360_v59  ;;  %v1295_v3 = vpop.f32.mrb[1].mxu1  ;;  %v1376_v10 = vmul.f32 %v2042_v0, %v2427_v45 }
 0x37f   :  { %v1697_v4 = vpack.c.bf16 %v1359_v63, %v1358_v62  ;;  %v2043_v7 = vpop.f32.mrb[2].mxu1  ;;  %v1374_v30 = vmul.f32 %v1295_v3, %v2396_v12 }
 0x380   :  { %1774 = vst [vmem:[#allocation6 + $0x8] sm:$0xff] %v1702_v16   ;;  %v1377_v11 = vmul.f32 %v2043_v7, %v2425_v44  ;;  %v1298_v17 = vpop.f32.mrb[3].mxu1 }
 0x381   :  { %1698 = vst [vmem:[#allocation6] sm:$0xff] %v1697_v4   ;;  %v1375_v29 = vmul.f32 %v1298_v17, %v2407_v19 }
 0x382   :  { %v1742_v18 = vpack.c.bf16 %v1377_v11, %v1376_v10 }
 0x383   :  { %v1737_v13 = vpack.c.bf16 %v1375_v29, %v1374_v30 }
 0x384   :  { %1782 = vst [vmem:[#allocation6 + $0x48] sm:$0xff] %v1742_v18  }
 0x385   :  { %1781 = vst [vmem:[#allocation6 + $0x40] sm:$0xff] %v1737_v13  }
 0x389   :  { %v2030_v20 = vpop.f32.mrb[4].mxu0 }
 0x38a   :  { %v1247_v21 = vpop.f32.mrb[5].mxu0  ;;  %v1364_v25 = vmul.f32 %v2030_v20, %v2451_v15 }
 0x38b   :  { %v2031_v22 = vpop.f32.mrb[6].mxu0  ;;  %v1362_v44 = vmul.f32 %v1247_v21, %v2435_v55 }
 0x38c   :  { %v1365_v26 = vmul.f32 %v2031_v22, %v2449_v14  ;;  %v1250_v45 = vpop.f32.mrb[7].mxu0 }
 0x38d   :  { %v1363_v27 = vmul.f32 %v1250_v45, %v2433_v54  ;;  %v2046_v35 = vpop.f32.mrb[4].mxu1 }
 0x38e   :  { %v1712_v12 = vpack.c.bf16 %v1365_v26, %v1364_v25  ;;  %v1311_v36 = vpop.f32.mrb[5].mxu1  ;;  %v1380_v38 = vmul.f32 %v2046_v35, %v2459_v31 }
 0x38f   :  { %v1707_v19 = vpack.c.bf16 %v1363_v27, %v1362_v44  ;;  %v2047_v37 = vpop.f32.mrb[6].mxu1  ;;  %v1378_v15 = vmul.f32 %v1311_v36, %v2443_v2 }
 0x390   :  { %1776 = vst [vmem:[#allocation6 + $0x18] sm:$0xff] %v1712_v12   ;;  %v1381_v41 = vmul.f32 %v2047_v37, %v2457_v28  ;;  %v1314_v46 = vpop.f32.mrb[7].mxu1 }
 0x391   :  { %1775 = vst [vmem:[#allocation6 + $0x10] sm:$0xff] %v1707_v19   ;;  %v1379_v14 = vmul.f32 %v1314_v46, %v2441_v1 }
 0x392   :  { %v1752_v47 = vpack.c.bf16 %v1381_v41, %v1380_v38 }
 0x393   :  { %v1747_v55 = vpack.c.bf16 %v1379_v14, %v1378_v15 }
 0x394   :  { %1784 = vst [vmem:[#allocation6 + $0x58] sm:$0xff] %v1752_v47  }
 0x395   :  { %1783 = vst [vmem:[#allocation6 + $0x50] sm:$0xff] %v1747_v55  }
 0x399   :  { %v2034_v54 = vpop.f32.mrb[8].mxu0 }
 0x39a   :  { %v1263_v48 = vpop.f32.mrb[9].mxu0  ;;  %v1368_v50 = vmul.f32 %v2034_v54, %v2483_v6 }
 0x39b   :  { %v2035_v49 = vpop.f32.mrb[10].mxu0  ;;  %v1366_v28 = vmul.f32 %v1263_v48, %v2467_v43 }
 0x39c   :  { %v1369_v33 = vmul.f32 %v2035_v49, %v2481_v5  ;;  %v1266_v31 = vpop.f32.mrb[11].mxu0 }
 0x39d   :  { %v1367_v51 = vmul.f32 %v1266_v31, %v2465_v42  ;;  %v2050_v52 = vpop.f32.mrb[8].mxu1 }
 0x39e   :  { %v1722_v2 = vpack.c.bf16 %v1369_v33, %v1368_v50  ;;  %v1327_v59 = vpop.f32.mrb[9].mxu1  ;;  %v1384_v61 = vmul.f32 %v2050_v52, %v2491_v24 }
 0x39f   :  { %v1717_v1 = vpack.c.bf16 %v1367_v51, %v1366_v28  ;;  %v2051_v60 = vpop.f32.mrb[10].mxu1  ;;  %v1382_v6 = vmul.f32 %v1327_v59, %v2475_v57 }
 0x3a0   :  { %1778 = vst [vmem:[#allocation6 + $0x28] sm:$0xff] %v1722_v2   ;;  %v1385_v62 = vmul.f32 %v2051_v60, %v2489_v23  ;;  %v1330_v63 = vpop.f32.mrb[11].mxu1 }
 0x3a1   :  { %1777 = vst [vmem:[#allocation6 + $0x20] sm:$0xff] %v1717_v1   ;;  %v1383_v5 = vmul.f32 %v1330_v63, %v2473_v56 }
 0x3a2   :  { %v1762_v0 = vpack.c.bf16 %v1385_v62, %v1384_v61 }
 0x3a3   :  { %v1757_v43 = vpack.c.bf16 %v1383_v5, %v1382_v6 }
 0x3a4   :  { %1786 = vst [vmem:[#allocation6 + $0x68] sm:$0xff] %v1762_v0  }
 0x3a5   :  { %1785 = vst [vmem:[#allocation6 + $0x60] sm:$0xff] %v1757_v43  }
 0x3a9   :  { %v2038_v42 = vpop.f32.mrb[12].mxu0 }
 0x3aa   :  { %v1279_v16 = vpop.f32.mrb[13].mxu0  ;;  %v1372_v4 = vmul.f32 %v2038_v42, %v2515_v9 }
 0x3ab   :  { %v2039_v3 = vpop.f32.mrb[14].mxu0  ;;  %v1370_v23 = vmul.f32 %v1279_v16, %v2499_v40 }
 0x3ac   :  { %v1373_v7 = vmul.f32 %v2039_v3, %v2513_v8  ;;  %v1282_v24 = vpop.f32.mrb[15].mxu0 }
 0x3ad   :  { %v1371_v10 = vmul.f32 %v1282_v24, %v2497_v39  ;;  %v2054_v11 = vpop.f32.mrb[12].mxu1 }
 0x3ae   :  { %v1732_v57 = vpack.c.bf16 %v1373_v7, %v1372_v4  ;;  %v1343_v17 = vpop.f32.mrb[13].mxu1  ;;  %v1388_v29 = vmul.f32 %v2054_v11, %v2523_v34 }
 0x3af   :  { %v1727_v56 = vpack.c.bf16 %v1371_v10, %v1370_v23  ;;  %v2055_v30 = vpop.f32.mrb[14].mxu1  ;;  %v1386_v9 = vmul.f32 %v1343_v17, %v2507_v58 }
 0x3b0   :  { %1780 = vst [vmem:[#allocation6 + $0x38] sm:$0xff] %v1732_v57   ;;  %v1389_v18 = vmul.f32 %v2055_v30, %v2521_v32  ;;  %v1346_v13 = vpop.f32.mrb[15].mxu1 }
 0x3b1   :  { %1779 = vst [vmem:[#allocation6 + $0x30] sm:$0xff] %v1727_v56   ;;  %v1387_v8 = vmul.f32 %v1346_v13, %v2505_v53 }
 0x3b2   :  { %v1772_v20 = vpack.c.bf16 %v1389_v18, %v1388_v29 }
 0x3b3   :  { %v1767_v40 = vpack.c.bf16 %v1387_v8, %v1386_v9 }
 0x3b4   :  { %1788 = vst [vmem:[#allocation6 + $0x78] sm:$0xff] %v1772_v20  }
 0x3b5   :  { %1787 = vst [vmem:[#allocation6 + $0x70] sm:$0xff] %v1767_v40  }
 0x3b6 PF:  { %s1552_s6 = sld [smem:[#allocation4]]  ;;  %s2146_s20 = smov [#allocation6]  }
 0x3b7   :  { %s1559_s5 = sshll.u32 %s2146_s20, 4  ;;  %s1560_s5 = int_to_ptr.vmem [resolvable:$true] %s1559_s5 }
 0x3b8   :  { %s2116_s23 = scalar_lea.vmem %s1560_s5, 2048  ;;  %p2121_p8 = scmp.lt.s32.totalorder %s1560_s5, %s1560_s5 }
 0x3b9   :  { %p2117_p7 = scmp.ne.s32.totalorder %s1560_s5, %s2116_s23  ;;  %p2122_p9 = scmp.lt.s32.totalorder %s2116_s23, %s2116_s23 }
 0x3bb   :  { %p2123_p10 = por %p2122_p9, %p2121_p8 }
 0x3bc   :  { %s1693_s19 = sshll.u32 %s1552_s6, 11 }
 0x3bd   :  { %s1558_s22 = scalar_lea.hbm %s2578_s8, %s1693_s19  ;;  %p2124_p11 = pnand %p2123_p10, %p2117_p7 }
 0x3bf   :  { %2127 = shalt.err (!%p2124_p11)
}
 0x3c0   :  { %s2128_s24 = scalar_lea.hbm %s1558_s22, 2048  ;;  %s2130_s27 = scalar_lea.hbm %s2578_s8, 2048 }
 0x3c1   :  { %p2129_p12 = scmp.ne.s32.totalorder %s1558_s22, %s2128_s24  ;;  %p2131_p13 = scmp.lt.u32.totalorder %s1558_s22, %s2578_s8 }
 0x3c2   :  { %p2132_p0 = scmp.lt.u32.totalorder %s2130_s27, %s2128_s24  ;;  %p2134_p2 = scmp.lt.u32.totalorder %s2128_s24, %s1558_s22 }
 0x3c4   :  { %p2133_p1 = por %p2132_p0, %p2131_p13 }
 0x3c6   :  { %p2135_p3 = por %p2134_p2, %p2133_p1 }
 0x3c8   :  { %p2136_p4 = pnand %p2135_p3, %p2129_p12 }
 0x3ca   :  { %2139 = shalt.err (!%p2136_p4)
}
 0x3cb   :  { %s2147_s11 = smov 64   ;;  %s2148_s28 = smov 4  }
 0x3cc   :  { %1565 = dma.vmem_to_hbm [thread:$0]  %s1560_s5, 2048, %s1558_s22, [#allocation7], %s2147_s11, %s2147_s11, %s2148_s28  }
 0x3cd   :  { %2142 = dma.done.wait [#allocation7], 2048  }
 0x3ce   :  { %2143 = vsyncadd [#allocation7], 4294965248 }
 0x3cf   :  { %1569 = vsyncpa [#allocation7], 1 }

</bundles_post_ra>
